<compile_context>
chip_gen: v7x
topology: tpu7x:2x2x1
jax: 0.10.0
libtpu: 0.0.40
codegen_flags: <defaults>
</compile_context>

<pallas_src>
import functools

import jax
import jax.numpy as jnp
from jax import lax
from jax.experimental import pallas as pl
from jax.experimental.pallas import tpu as pltpu


# ---------------------------------------------------------------------------
# Kernel: one GEMM + lane-dense epilogue per grid step.
# ---------------------------------------------------------------------------
def _make_kernel(bb, PH, K, N):
    M = bb * PH

    def kernel(lhs_ref, w_ref, g_ref, b_ref, o_ref):
        # lhs_ref : (bb, PH, K)   bf16  im2col rows (alpha already folded in)
        # w_ref   : (K, N)        bf16  Toeplitz/(kd,kh)-flattened conv weight (shared, resident)
        # g_ref   : (bb, 1, N)    f32   per-example gamma, tiled over Wo
        # b_ref   : (bb, 1, N)    f32   per-example bias,  tiled over Wo
        # o_ref   : (bb, PH, N)   f32
        #
        # The reshapes below only merge/split leading dims (PH is a multiple of 8 and the lane
        # dim is untouched), so they are layout-preserving (no relayout copies).
        acc = jnp.dot(lhs_ref[...].reshape(M, K), w_ref[...],
                      preferred_element_type=jnp.float32)            # single MXU GEMM
        out = acc.reshape(bb, PH, N) * g_ref[...] + b_ref[...]       # lane-dense f32 epilogue
        o_ref[...] = out.astype(o_ref.dtype)

    return kernel


# ---------------------------------------------------------------------------
# Wrapper-side layout plumbing (plain JAX, fused by XLA).
# ---------------------------------------------------------------------------
def _expand_per_example(param, batch, num_models):
    """torch: cat([p]*k, dim=1).view(-1, C)  (+ wrap-around for `extra`)."""
    num = batch // num_models
    extra = batch - num * num_models
    pe = jnp.repeat(param, num, axis=0)              # model m owns rows m*num .. m*num+num-1
    if extra:
        pe = jnp.concatenate([pe, pe[:extra]], axis=0)
    return pe                                        # (batch, C)


def _toeplitz_weight_bf16(weight_oidhw, W, Wo):
    """(C_out,C_in,KD,KH,KW) -> (KD*KH*W*C_in, Wo*C_out): banded along W so the kw loop is part
    of the contraction, and (kd,kh) flattened onto the contraction dim (zeros off the band)."""
    C_out, C_in, KD, KH, KW = weight_oidhw.shape
    w = jnp.transpose(weight_oidhw, (2, 3, 4, 1, 0))               # (KD,KH,KW,C_in,C_out)
    kw = jnp.arange(W)[:, None] - jnp.arange(Wo)[None, :]          # (W, Wo): kw = w - wo
    band = (kw >= 0) & (kw < KW)
    wt = w[:, :, jnp.clip(kw, 0, KW - 1), :, :]                    # (KD,KH,W,Wo,C_in,C_out)
    wt = wt * band[None, None, :, :, None, None].astype(w.dtype)
    wt = jnp.transpose(wt, (0, 1, 2, 4, 3, 5))                     # (KD,KH,W,C_in,Wo,C_out)
    return wt.reshape(KD * KH * W * C_in, Wo * C_out).astype(jnp.bfloat16)


def _im2col_kdkh(x_cl, KD, KH, Do, Ho):
    """(B, D, H, W*C_in) -> (B, Do*Ho, KD*KH*W*C_in); (kd,kh) stacked onto the lane dim in the
    same (kd, kh, w, c_in) order the Toeplitz weight uses."""
    B = x_cl.shape[0]
    WC = x_cl.shape[-1]
    patches = [x_cl[:, kd:kd + Do, kh:kh + Ho, :]
               for kd in range(KD) for kh in range(KH)]
    lhs = jnp.stack(patches, axis=3)                               # (B, Do, Ho, KD*KH, W*C_in)
    return lhs.reshape(B, Do * Ho, KD * KH * WC)


def _tensorcores_per_chip():
    # v7x has 2 TensorCores per chip; v5e / v6e (and older) have 1.
    try:
        kind = jax.devices()[0].device_kind.lower()
    except Exception:
        return 1
    return 2 if "v7" in kind else 1


# ---------------------------------------------------------------------------
# Pallas-call wrapper.
# ---------------------------------------------------------------------------
@functools.partial(jax.jit, static_argnames=("num_models", "grid_steps"))
def _batch_ensemble_conv3d_impl(x_ncdhw, weight_oidhw, alpha, gamma, bias, *,
                                num_models, grid_steps):
    """x_ncdhw: (B, C_in, D, H, W); weight_oidhw: (C_out, C_in, KD, KH, KW).
    Computes conv3d(x * alpha_pe) * gamma_pe + bias_pe (stride=1, padding=0)."""
    B, C_in, D, H, W = x_ncdhw.shape
    C_out, _, KD, KH, KW = weight_oidhw.shape
    Do, Ho, Wo = D - KD + 1, H - KH + 1, W - KW + 1
    PH = Do * Ho                       # rows per example
    K = KD * KH * W * C_in             # contraction dim (kd, kh, w, c_in)
    N = Wo * C_out                     # lane dim of the output (128 here)
    bb = B // grid_steps

    # --- BatchEnsemble rank-1 factors expanded per example ---
    a_pe = _expand_per_example(alpha, B, num_models).astype(jnp.float32)    # (B, C_in)
    g_pe = _expand_per_example(gamma, B, num_models).astype(jnp.float32)    # (B, C_out)
    b_pe = _expand_per_example(bias, B, num_models).astype(jnp.float32)     # (B, C_out)

    # --- channels-last + alpha (fused by XLA into the gather below) + single bf16 rounding ---
    x_cl = jnp.transpose(x_ncdhw, (0, 2, 3, 4, 1))                          # (B, D, H, W, C_in)
    x_cl = (x_cl * a_pe[:, None, None, None, :]).astype(jnp.bfloat16)
    x_cl = x_cl.reshape(B, D, H, W * C_in)
    lhs = _im2col_kdkh(x_cl, KD, KH, Do, Ho)                                # (B, PH, K)  bf16

    w_t = _toeplitz_weight_bf16(weight_oidhw, W, Wo)                        # (K, N)      bf16
    g_t = jnp.tile(g_pe, (1, Wo)).reshape(B, 1, N)                          # (B, 1, N)   f32
    b_t = jnp.tile(b_pe, (1, Wo)).reshape(B, 1, N)                          # (B, 1, N)   f32

    # VMEM guard (v7x: 64 MiB physical / 32 MiB default scoped): resident weight + double-
    # buffered lhs/out + small epilogue vectors.
    # TODO(synk): tile N or drop the W-Toeplitz band if a larger config ever trips this.
    vmem_bytes = (K * N * 2                       # resident Toeplitz weight
                  + 2 * bb * PH * K * 2           # double-buffered lhs block
                  + 2 * bb * PH * N * 4           # double-buffered out block
                  + 4 * bb * N * 4)               # gamma / bias blocks
    assert vmem_bytes < 24 * 1024 * 1024, f"VMEM budget exceeded: {vmem_bytes} bytes"

    cost = pl.CostEstimate(
        flops=2 * B * PH * N * K,
        transcendentals=0,
        bytes_accessed=B * PH * K * 2 + K * N * 2 + 2 * B * N * 4 + B * PH * N * 4)

    kernel = _make_kernel(bb, PH, K, N)
    out = pl.pallas_call(
        kernel,
        out_shape=jax.ShapeDtypeStruct((B, PH, N), jnp.float32),
        grid_spec=pltpu.PrefetchScalarGridSpec(
            num_scalar_prefetch=0,
            grid=(grid_steps,),
            in_specs=[
                pl.BlockSpec((bb, PH, K), lambda i: (i, 0, 0)),
                # Shared weight: constant block index -> stays resident across grid steps.
                pl.BlockSpec((K, N), lambda i: (0, 0)),
                pl.BlockSpec((bb, 1, N), lambda i: (i, 0, 0)),
                pl.BlockSpec((bb, 1, N), lambda i: (i, 0, 0)),
            ],
            out_specs=pl.BlockSpec((bb, PH, N), lambda i: (i, 0, 0)),
        ),
        compiler_params=pltpu.CompilerParams(dimension_semantics=("parallel",)),
        cost_estimate=cost,
    )(lhs, w_t, g_t, b_t)

    out = out.reshape(B, Do, Ho, Wo, C_out)
    return jnp.transpose(out, (0, 4, 1, 2, 3))                              # NCDHW, f32


def batch_ensemble_conv3d(x_ncdhw, weight_oidhw, alpha, gamma, bias, *, num_models):
    B = x_ncdhw.shape[0]
    tc = _tensorcores_per_chip()
    # One grid step on single-TC chips (v5e/v6e); split the batch across the 2 TCs on v7x.
    grid_steps = tc if (tc > 1 and B % tc == 0) else 1
    return _batch_ensemble_conv3d_impl(x_ncdhw, weight_oidhw, alpha, gamma, bias,
                                       num_models=num_models, grid_steps=grid_steps)


# ---------------------------------------------------------------------------
# Pure-JAX reference of the module forward.
# ---------------------------------------------------------------------------
def _reference(x_ncdhw, weight_oidhw, alpha, gamma, bias, num_models, *, match_kernel_rounding):
    """If match_kernel_rounding, applies the same single bf16 rounding the kernel applies to its
    MXU operands (x*alpha and weight); the conv math itself stays f32."""
    B = x_ncdhw.shape[0]
    a_pe = _expand_per_example(alpha, B, num_models)[:, :, None, None, None]
    g_pe = _expand_per_example(gamma, B, num_models)[:, :, None, None, None]
    b_pe = _expand_per_example(bias, B, num_models)[:, :, None, None, None]
    if match_kernel_rounding:
        xs = (x_ncdhw * a_pe).astype(jnp.bfloat16).astype(jnp.float32)
        w = weight_oidhw.astype(jnp.bfloat16).astype(jnp.float32)
    else:
        xs = x_ncdhw * a_pe
        w = weight_oidhw
    y = lax.conv_general_dilated(
        xs, w, window_strides=(1, 1, 1), padding="VALID",
        dimension_numbers=("NCDHW", "OIDHW", "NCDHW"),
        precision=lax.Precision.HIGHEST)
    return y * g_pe + b_pe


if __name__ == "__main__":
    # Module config (small): Conv3d(in=8, out=16, kernel=3, stride=1, padding=0, bias=False),
    # num_models=4, train_gamma=True, bias=True, random_sign_init=True.
    num_models = 4
    C_in, C_out, Kk = 8, 16, 3
    B, D, H, W = 8, 10, 10, 10

    key = jax.random.PRNGKey(0)
    kw_, ka, kg, kb, ksa, ksg, kx = jax.random.split(key, 7)

    fan_in = C_in * Kk * Kk * Kk
    bound_w = 1.0 / (fan_in ** 0.5)
    # Deterministic stand-ins for the torch initializers (same shapes / distributions).
    weight = jax.random.uniform(kw_, (C_out, C_in, Kk, Kk, Kk), jnp.float32, -bound_w, bound_w)
    alpha = 1.0 + 0.5 * jax.random.normal(ka, (num_models, C_in), jnp.float32)
    gamma = 1.0 + 0.5 * jax.random.normal(kg, (num_models, C_out), jnp.float32)
    # random_sign_init: multiply by random +-1
    alpha = alpha * (2.0 * jax.random.bernoulli(ksa, 0.5, (num_models, C_in)).astype(jnp.float32) - 1.0)
    gamma = gamma * (2.0 * jax.random.bernoulli(ksg, 0.5, (num_models, C_out)).astype(jnp.float32) - 1.0)
    bias = jax.random.uniform(kb, (num_models, C_out), jnp.float32, -bound_w, bound_w)

    x = jax.random.normal(kx, (B, C_in, D, H, W), jnp.float32)

    out = batch_ensemble_conv3d(x, weight, alpha, gamma, bias, num_models=num_models)
    out = jax.block_until_ready(out)
    assert out.shape == (B, C_out, D - Kk + 1, H - Kk + 1, W - Kk + 1)

    # 1) Exactness of the im2col/Toeplitz-GEMM restructuring: reference with the SAME bf16
    #    rounding of the MXU operands (f32 conv math) -> should match to accumulation-order noise.
    ref_q = jax.block_until_ready(
        _reference(x, weight, alpha, gamma, bias, num_models, match_kernel_rounding=True))
    err_q = float(jnp.max(jnp.abs(out - ref_q)))
    assert jnp.allclose(out, ref_q, rtol=1e-3, atol=1e-3), err_q

    # 2) Module semantics vs a pure-f32 reference: tolerance covers the bf16 rounding of the
    #    MXU operands (x*alpha and weight), which is the only deliberate precision change.
    ref_f = jax.block_until_ready(
        _reference(x, weight, alpha, gamma, bias, num_models, match_kernel_rounding=False))
    err_f = float(jnp.max(jnp.abs(out - ref_f)))
    assert jnp.allclose(out, ref_f, rtol=5e-2, atol=5e-2), err_f

    print("KERNEL_OK")
</pallas_src>

<mosaic_0001>
module attributes {stable_mosaic.version = 11 : i64} {
  func.func @kernel(%arg0: i32, %arg1: memref<8x64x720xbf16, #tpu.memory_space<vmem>>, %arg2: memref<720x128xbf16, #tpu.memory_space<vmem>>, %arg3: memref<8x1x128xf32, #tpu.memory_space<vmem>>, %arg4: memref<8x1x128xf32, #tpu.memory_space<vmem>>, %arg5: memref<8x64x128xf32, #tpu.memory_space<vmem>>) attributes {dimension_semantics = [#tpu.dimension_semantics<parallel>], iteration_bounds = array<i64: 1>, scalar_prefetch = 0 : i64, scratch_operands = 0 : i64, tpu.core_type = #tpu.core_type<tc>, window_params = [{transform_indices = @transform_0, window_bounds = array<i64: 8, 64, 720>}, {pipeline_mode = #tpu.pipeline_mode<synchronous>, transform_indices = @transform_1, window_bounds = array<i64: 720, 128>}, {transform_indices = @transform_2, window_bounds = array<i64: 8, 1, 128>}, {transform_indices = @transform_3, window_bounds = array<i64: 8, 1, 128>}, {transform_indices = @transform_4, window_bounds = array<i64: 8, 64, 128>}]} {
    %c0 = arith.constant 0 : index
    %c0_0 = arith.constant 0 : index
    %c0_1 = arith.constant 0 : index
    %0 = vector.load %arg1[%c0, %c0_0, %c0_1] : memref<8x64x720xbf16, #tpu.memory_space<vmem>>, vector<8x64x720xbf16>
    %1 = vector.shape_cast %0 : vector<8x64x720xbf16> to vector<512x720xbf16>
    %c0_2 = arith.constant 0 : index
    %c0_3 = arith.constant 0 : index
    %2 = vector.load %arg2[%c0_2, %c0_3] : memref<720x128xbf16, #tpu.memory_space<vmem>>, vector<720x128xbf16>
    %cst = arith.constant dense<0.000000e+00> : vector<512x128xf32>
    %3 = tpu.matmul %1, %2, %cst {dimension_numbers = #tpu.dot_dimension_numbers<[1], [0], [0], [1], [0, 0, 1, 1], [], []>} : vector<512x720xbf16>, vector<720x128xbf16>, vector<512x128xf32> -> vector<512x128xf32>
    %4 = vector.shape_cast %3 : vector<512x128xf32> to vector<8x64x128xf32>
    %c0_4 = arith.constant 0 : index
    %c0_5 = arith.constant 0 : index
    %c0_6 = arith.constant 0 : index
    %5 = vector.load %arg3[%c0_4, %c0_5, %c0_6] : memref<8x1x128xf32, #tpu.memory_space<vmem>>, vector<8x1x128xf32>
    %6 = vector.broadcast %5 : vector<8x1x128xf32> to vector<8x64x128xf32>
    %7 = arith.mulf %4, %6 : vector<8x64x128xf32>
    %c0_7 = arith.constant 0 : index
    %c0_8 = arith.constant 0 : index
    %c0_9 = arith.constant 0 : index
    %8 = vector.load %arg4[%c0_7, %c0_8, %c0_9] : memref<8x1x128xf32, #tpu.memory_space<vmem>>, vector<8x1x128xf32>
    %9 = vector.broadcast %8 : vector<8x1x128xf32> to vector<8x64x128xf32>
    %10 = arith.addf %7, %9 : vector<8x64x128xf32>
    %c0_10 = arith.constant 0 : index
    %c0_11 = arith.constant 0 : index
    %c0_12 = arith.constant 0 : index
    %11 = vector.load %arg5[%c0_10, %c0_11, %c0_12] : memref<8x64x128xf32, #tpu.memory_space<vmem>>, vector<8x64x128xf32>
    tpu.vector_store %arg5[%c0_10, %c0_11, %c0_12], %10 {strides = array<i32>} : memref<8x64x128xf32, #tpu.memory_space<vmem>>, vector<8x64x128xf32>,
    return
  }
  func.func @transform_0(%arg0: i32) -> (i32, i32, i32) {
    %c0_i32 = arith.constant 0 : i32
    %c0_i32_0 = arith.constant 0 : i32
    %c0_i32_1 = arith.constant 0 : i32
    return %arg0, %c0_i32, %c0_i32_0 : i32, i32, i32
  }
  func.func @transform_1(%arg0: i32) -> (i32, i32) {
    %c0_i32 = arith.constant 0 : i32
    %c0_i32_0 = arith.constant 0 : i32
    %c0_i32_1 = arith.constant 0 : i32
    return %c0_i32, %c0_i32_0 : i32, i32
  }
  func.func @transform_2(%arg0: i32) -> (i32, i32, i32) {
    %c0_i32 = arith.constant 0 : i32
    %c0_i32_0 = arith.constant 0 : i32
    %c0_i32_1 = arith.constant 0 : i32
    return %arg0, %c0_i32, %c0_i32_0 : i32, i32, i32
  }
  func.func @transform_3(%arg0: i32) -> (i32, i32, i32) {
    %c0_i32 = arith.constant 0 : i32
    %c0_i32_0 = arith.constant 0 : i32
    %c0_i32_1 = arith.constant 0 : i32
    return %arg0, %c0_i32, %c0_i32_0 : i32, i32, i32
  }
  func.func @transform_4(%arg0: i32) -> (i32, i32, i32) {
    %c0_i32 = arith.constant 0 : i32
    %c0_i32_0 = arith.constant 0 : i32
    %c0_i32_1 = arith.constant 0 : i32
    return %arg0, %c0_i32, %c0_i32_0 : i32, i32, i32
  }
}

</mosaic_0001>

<bundles_post_ra>
// kernel: _batch_ensemble_conv3d_impl.1
= control target key start
LH: loop header
LB: loop body
LE: loop exit
PB: predicated region body
PF: predicated region fallthrough
CT: control target
= control target key end

     0   :  { %v3613_v0 = vmov 0   ;;  %vm1498_vm0 = vcmask 654336   ;;  %s4863_s1 = inlined_call_operand.vmem [shape: bf16[720,128], index: 1, kind: input, shape index: {}]   ;;  %s4864_s0 = inlined_call_operand.vmem [shape: bf16[8,64,720], index: 0, kind: input, shape index: {}]   ;;  %s4865_s2 = inlined_call_operand.vmem [shape: f32[8,1,128], index: 2, kind: input, shape index: {}]   ;;  %s4866_s3 = inlined_call_operand.vmem [shape: f32[8,1,128], index: 3, kind: input, shape index: {}]   ;;  %s4867_s4 = inlined_call_operand.vmem [shape: f32[8,64,128], index: 4, kind: output, shape index: {}]  }
   0x1   :  { %1595 = vmatprep.subr.bf16.mxu1 %v3613_v0  ;;  %1884 = vmatprep.subr.bf16.mxu0 %v3613_v0  ;;  %v3280_v1 = vld [vmem:[%s4863_s1] sm:$0xff]   ;;  %v3282_v3 = vld [vmem:[%s4863_s1 + $0x8] sm:$0xff]   ;;  %v3284_v5 = vld [vmem:[%s4863_s1 + $0x10] sm:$0xff]  }
   0x2   :  { %v3647_v2 = vld [vmem:[%s4863_s1 + $0x80] sm:$0xff]   ;;  %1596 = vmatpush1.bf16.msra.mxu1 %v3280_v1  ;;  %v3657_v4 = vld [vmem:[%s4863_s1 + $0x88] sm:$0xff]   ;;  %v3668_v6 = vld [vmem:[%s4863_s1 + $0x90] sm:$0xff]  }
   0x3   :  { %1885 = vmatpush1.bf16.msra.mxu0 %v3647_v2  ;;  %1597 = vmatprep.subr.bf16.mxu1 %v3613_v0  ;;  %v3286_v7 = vld [vmem:[%s4863_s1 + $0x18] sm:$0xff]   ;;  %v3288_v9 = vld [vmem:[%s4863_s1 + $0x20] sm:$0xff]   ;;  %v3290_v11 = vld [vmem:[%s4863_s1 + $0x28] sm:$0xff]  }
   0x4   :  { %1886 = vmatprep.subr.bf16.mxu0 %v3613_v0  ;;  %v3679_v8 = vld [vmem:[%s4863_s1 + $0x98] sm:$0xff]   ;;  %v3690_v10 = vld [vmem:[%s4863_s1 + $0xa0] sm:$0xff]   ;;  %v3701_v12 = vld [vmem:[%s4863_s1 + $0xa8] sm:$0xff]  }
   0x5   :  { %v3292_v13 = vld [vmem:[%s4863_s1 + $0x30] sm:$0xff]   ;;  %v3294_v15 = vld [vmem:[%s4863_s1 + $0x38] sm:$0xff]   ;;  %v3296_v17 = vld [vmem:[%s4863_s1 + $0x40] sm:$0xff]  }
   0x6   :  { %1598 = vmatpush1.bf16.msra.mxu1 %v3282_v3  ;;  %v3712_v14 = vld [vmem:[%s4863_s1 + $0xb0] sm:$0xff]   ;;  %v3723_v16 = vld [vmem:[%s4863_s1 + $0xb8] sm:$0xff]   ;;  %v3734_v18 = vld [vmem:[%s4863_s1 + $0xc0] sm:$0xff]  }
   0x7   :  { %1887 = vmatpush1.bf16.msra.mxu0 %v3657_v4  ;;  %1599 = vmatprep.subr.bf16.mxu1 %v3613_v0  ;;  %v3314_v19 = vld [vmem:[%s4864_s0 + $0x4] ss:$24 sps:$4 sm:$0xff]   ;;  %v3298_v20 = vld [vmem:[%s4863_s1 + $0x48] sm:$0xff]   ;;  %v3300_v23 = vld [vmem:[%s4863_s1 + $0x50] sm:$0xff]  }
   0x8   :  { %1888 = vmatprep.subr.bf16.mxu0 %v3613_v0  ;;  %v3317_v21 = vld [vmem:[%s4864_s0 + $0xc] ss:$24 sps:$4 sm:$0xff]   ;;  %1627 = vmatprep.mubr.bf16.mxu1 %v3314_v19  ;;  %v3762_v24 = vld [vmem:[%s4863_s1 + $0xd0] sm:$0xff]   ;;  %v3302_v25 = vld [vmem:[%s4863_s1 + $0x58] sm:$0xff]  }
   0x9   :  { %v3751_v22 = vld [vmem:[%s4863_s1 + $0xc8] sm:$0xff]   ;;  %1916 = vmatprep.mubr.bf16.mxu0 %v3317_v21  ;;  %v3773_v26 = vld [vmem:[%s4863_s1 + $0xd8] sm:$0xff]   ;;  %v3304_v27 = vld [vmem:[%s4863_s1 + $0x60] sm:$0xff]  }
   0xa   :  { %1600 = vmatpush1.bf16.msra.mxu1 %v3284_v5  ;;  %v3784_v28 = vld [vmem:[%s4863_s1 + $0xe0] sm:$0xff]   ;;  %v3306_v29 = vld [vmem:[%s4863_s1 + $0x68] sm:$0xff]   ;;  %v3308_v31 = vld [vmem:[%s4863_s1 + $0x70] sm:$0xff]  }
   0xb   :  { %1889 = vmatpush1.bf16.msra.mxu0 %v3668_v6  ;;  %1601 = vmatprep.subr.bf16.mxu1 %v3613_v0  ;;  %v3795_v30 = vld [vmem:[%s4863_s1 + $0xe8] sm:$0xff]   ;;  %v3806_v32 = vld [vmem:[%s4863_s1 + $0xf0] sm:$0xff]   ;;  %v3310_v33 = vld [vmem:[%s4863_s1 + $0x78] sm:$0xff]  }
   0xc   :  { %1890 = vmatprep.subr.bf16.mxu0 %v3613_v0  ;;  %v3817_v34 = vld [vmem:[%s4863_s1 + $0xf8] sm:$0xff]   ;;  %v3315_v36 = vld [vmem:[%s4864_s0 + $0x8] ss:$24 sps:$4 sm:$0xff]   ;;  %v3319_v38 = vld [vmem:[%s4864_s0 + $0x34] ss:$24 sps:$4 sm:$0xff]  }
   0xd   :  { %v3312_v35 = vld [vmem:[%s4864_s0] ss:$24 sps:$4 sm:$0xff]   ;;  %v3321_v39 = vld [vmem:[%s4864_s0 + $0x3c] ss:$24 sps:$4 sm:$0xff]   ;;  %v3325_v40 = vld [vmem:[%s4863_s1 + $0x108] sm:$0xff]  }
   0xe   :  { %1602 = vmatpush1.bf16.msra.mxu1 %v3286_v7  ;;  %v3318_v37 = vld [vmem:[%s4863_s1 + $0x100] sm:$0xff]   ;;  %v3323_v41 = vld [vmem:[%s4864_s0 + $0x30] ss:$24 sps:$4 sm:$0xff]   ;;  %v3343_v46 = vld [vmem:[%s4863_s1 + $0x118] sm:$0xff]  }
   0xf   :  { %1891 = vmatpush1.bf16.msra.mxu0 %v3679_v8  ;;  %1603 = vmatprep.subr.bf16.mxu1 %v3613_v0  ;;  %v3324_v42 = vld [vmem:[%s4864_s0 + $0x38] ss:$24 sps:$4 sm:$0xff]   ;;  %v3326_v43 = vld [vmem:[%s4864_s0 + $0x64] ss:$24 sps:$4 sm:$0xff]   ;;  %v3331_v48 = vld [vmem:[%s4864_s0 + $0x68] ss:$24 sps:$4 sm:$0xff]  }
  0x10   :  { %1892 = vmatprep.subr.bf16.mxu0 %v3613_v0  ;;  %v3328_v44 = vld [vmem:[%s4864_s0 + $0x6c] ss:$24 sps:$4 sm:$0xff]   ;;  %v3332_v45 = vld [vmem:[%s4863_s1 + $0x110] sm:$0xff]   ;;  %v3330_v47 = vld [vmem:[%s4864_s0 + $0x60] ss:$24 sps:$4 sm:$0xff]  }
  0x11   :  { %v3333_v49 = vld [vmem:[%s4864_s0 + $0x94] ss:$24 sps:$4 sm:$0xff]   ;;  %v3352_v51 = vld [vmem:[%s4863_s1 + $0x120] sm:$0xff]   ;;  %v3337_v53 = vld [vmem:[%s4864_s0 + $0x90] ss:$24 sps:$4 sm:$0xff]  }
  0x12   :  { %1604 = vmatpush1.bf16.msra.mxu1 %v3288_v9  ;;  %v3335_v50 = vld [vmem:[%s4864_s0 + $0x9c] ss:$24 sps:$4 sm:$0xff]   ;;  %v3359_v52 = vld [vmem:[%s4863_s1 + $0x128] sm:$0xff]   ;;  %v3338_v54 = vld [vmem:[%s4864_s0 + $0x98] ss:$24 sps:$4 sm:$0xff]  }
  0x13   :  { %1893 = vmatpush1.bf16.msra.mxu0 %v3690_v10  ;;  %1605 = vmatprep.subr.bf16.mxu1 %v3613_v0  ;;  %v3339_v55 = vld [vmem:[%s4864_s0 + $0xc4] ss:$24 sps:$4 sm:$0xff]   ;;  %v3366_v57 = vld [vmem:[%s4863_s1 + $0x130] sm:$0xff]   ;;  %v3344_v59 = vld [vmem:[%s4864_s0 + $0xc0] ss:$24 sps:$4 sm:$0xff]  }
  0x14   :  { %1894 = vmatprep.subr.bf16.mxu0 %v3613_v0  ;;  %v3341_v56 = vld [vmem:[%s4864_s0 + $0xcc] ss:$24 sps:$4 sm:$0xff]   ;;  %v3373_v58 = vld [vmem:[%s4863_s1 + $0x138] sm:$0xff]   ;;  %v3345_v60 = vld [vmem:[%s4864_s0 + $0xc8] ss:$24 sps:$4 sm:$0xff]  }
  0x15   :  { %v3346_v61 = vld [vmem:[%s4864_s0 + $0xf4] ss:$24 sps:$4 sm:$0xff]   ;;  %v3386_v63 = vld [vmem:[%s4863_s1 + $0x140] sm:$0xff]   ;;  %v3351_v3 = vld [vmem:[%s4864_s0 + $0xf8] ss:$24 sps:$4 sm:$0xff]  }
  0x16   :  { %1606 = vmatpush1.bf16.msra.mxu1 %v3290_v11  ;;  %v3348_v62 = vld [vmem:[%s4864_s0 + $0xfc] ss:$24 sps:$4 sm:$0xff]   ;;  %v3393_v1 = vld [vmem:[%s4863_s1 + $0x148] sm:$0xff]   ;;  %v3357_v7 = vld [vmem:[%s4864_s0 + $0x120] ss:$24 sps:$4 sm:$0xff]  }
  0x17   :  { %1895 = vmatpush1.bf16.msra.mxu0 %v3701_v12  ;;  %1607 = vmatprep.subr.bf16.mxu1 %v3613_v0  ;;  %v3355_v5 = vld [vmem:[%s4864_s0 + $0x12c] ss:$24 sps:$4 sm:$0xff]   ;;  %v3358_v9 = vld [vmem:[%s4864_s0 + $0x128] ss:$24 sps:$4 sm:$0xff]   ;;  %v3362_v11 = vld [vmem:[%s4864_s0 + $0x15c] ss:$24 sps:$4 sm:$0xff]  }
  0x18   :  { %1896 = vmatprep.subr.bf16.mxu0 %v3613_v0  ;;  %v3374_v19 = vld [vmem:[%s4864_s0 + $0x1b4] ss:$24 sps:$4 sm:$0xff]   ;;  %v3378_v21 = vld [vmem:[%s4864_s0 + $0x1b0] ss:$24 sps:$4 sm:$0xff]  }
  0x1a   :  { %1608 = vmatpush1.bf16.msra.mxu1 %v3292_v13  ;;  %v3364_v13 = vld [vmem:[%s4864_s0 + $0x150] ss:$24 sps:$4 sm:$0xff]  }
  0x1b   :  { %1897 = vmatpush1.bf16.msra.mxu0 %v3712_v14  ;;  %1609 = vmatprep.subr.bf16.mxu1 %v3613_v0 }
  0x1c   :  { %1898 = vmatprep.subr.bf16.mxu0 %v3613_v0 }
  0x1e   :  { %1610 = vmatpush1.bf16.msra.mxu1 %v3294_v15  ;;  %v3367_v15 = vld [vmem:[%s4864_s0 + $0x184] ss:$24 sps:$4 sm:$0xff]  }
  0x1f   :  { %1899 = vmatpush1.bf16.msra.mxu0 %v3723_v16  ;;  %1611 = vmatprep.subr.bf16.mxu1 %v3613_v0 }
  0x20   :  { %1900 = vmatprep.subr.bf16.mxu0 %v3613_v0 }
  0x22   :  { %1612 = vmatpush1.bf16.msra.mxu1 %v3296_v17  ;;  %v3371_v17 = vld [vmem:[%s4864_s0 + $0x180] ss:$24 sps:$4 sm:$0xff]  }
  0x23   :  { %1901 = vmatpush1.bf16.msra.mxu0 %v3734_v18  ;;  %1613 = vmatprep.subr.bf16.mxu1 %v3613_v0 }
  0x24   :  { %1902 = vmatprep.subr.bf16.mxu0 %v3613_v0 }
  0x26   :  { %1614 = vmatpush1.bf16.msra.mxu1 %v3298_v20  ;;  %v3376_v20 = vld [vmem:[%s4864_s0 + $0x1bc] ss:$24 sps:$4 sm:$0xff]  }
  0x27   :  { %1903 = vmatpush1.bf16.msra.mxu0 %v3751_v22  ;;  %1615 = vmatprep.subr.bf16.mxu1 %v3613_v0 }
  0x28   :  { %1904 = vmatprep.subr.bf16.mxu0 %v3613_v0 }
  0x2a   :  { %1616 = vmatpush1.bf16.msra.mxu1 %v3300_v23  ;;  %v3380_v23 = vld [vmem:[%s4864_s0 + $0x1e4] ss:$24 sps:$4 sm:$0xff]  }
  0x2b   :  { %1905 = vmatpush1.bf16.msra.mxu0 %v3762_v24  ;;  %1617 = vmatprep.subr.bf16.mxu1 %v3613_v0 }
  0x2c   :  { %1906 = vmatprep.subr.bf16.mxu0 %v3613_v0 }
  0x2e   :  { %1618 = vmatpush1.bf16.msra.mxu1 %v3302_v25  ;;  %v3385_v25 = vld [vmem:[%s4864_s0 + $0x1e8] ss:$24 sps:$4 sm:$0xff]  }
  0x2f   :  { %1907 = vmatpush1.bf16.msra.mxu0 %v3773_v26  ;;  %1619 = vmatprep.subr.bf16.mxu1 %v3613_v0 }
  0x30   :  { %1908 = vmatprep.subr.bf16.mxu0 %v3613_v0 }
  0x32   :  { %1620 = vmatpush1.bf16.msra.mxu1 %v3304_v27  ;;  %v3389_v27 = vld [vmem:[%s4864_s0 + $0x21c] ss:$24 sps:$4 sm:$0xff]  }
  0x33   :  { %1909 = vmatpush1.bf16.msra.mxu0 %v3784_v28  ;;  %1621 = vmatprep.subr.bf16.mxu1 %v3613_v0 }
  0x34   :  { %1910 = vmatprep.subr.bf16.mxu0 %v3613_v0 }
  0x36   :  { %1622 = vmatpush1.bf16.msra.mxu1 %v3306_v29  ;;  %v3392_v29 = vld [vmem:[%s4864_s0 + $0x218] ss:$24 sps:$4 sm:$0xff]  }
  0x37   :  { %1911 = vmatpush1.bf16.msra.mxu0 %v3795_v30  ;;  %1623 = vmatprep.subr.bf16.mxu1 %v3613_v0 }
  0x38   :  { %1912 = vmatprep.subr.bf16.mxu0 %v3613_v0 }
  0x3a   :  { %1624 = vmatpush1.bf16.msra.mxu1 %v3308_v31  ;;  %v3396_v31 = vld [vmem:[%s4864_s0 + $0x24c] ss:$24 sps:$4 sm:$0xff]  }
  0x3b   :  { %1913 = vmatpush1.bf16.msra.mxu0 %v3806_v32  ;;  %1625 = vmatprep.subr.bf16.mxu1 %v3613_v0 }
  0x3c   :  { %1914 = vmatprep.subr.bf16.mxu0 %v3613_v0 }
  0x3e   :  { %1626 = vmatpush1.bf16.msra.mxu1 %v3310_v33  ;;  %v3399_v33 = vld [vmem:[%s4864_s0 + $0x248] ss:$24 sps:$4 sm:$0xff]  }
  0x3f   :  { %1915 = vmatpush1.bf16.msra.mxu0 %v3817_v34  ;;  %3055 = vmatprep.subr.bf16.mxu1 %v3613_v0 }
  0x40   :  { %2173 = vmatprep.subr.bf16.mxu0 %v3613_v0 }
  0x41   :  { %1628 = vmatmul.mubr.bf16.vlgmr.msra.gmra.mrb[0].mxu1 %v3312_v35  ;;  %v3403_v35 = vld [vmem:[%s4864_s0 + $0x27c] ss:$24 sps:$4 sm:$0xff]  }
  0x42   :  { %1917 = vmatmul.mubr.bf16.vlgmr.msra.gmra.mrb[0].mxu0 %v3315_v36  ;;  %3071 = vmatpush1.bf16.msra.mxu1 %v3647_v2  ;;  %v3350_v2 = vld [vmem:[%s4864_s0 + $0xf0] ss:$24 sps:$4 sm:$0xff]  }
  0x43   :  { %2174 = vmatpush1.bf16.msra.mxu0 %v3318_v37  ;;  %1635 = vmatprep.mubr.bf16.mxu1 %v3319_v38  ;;  %v3405_v36 = vld [vmem:[%s4864_s0 + $0x270] ss:$24 sps:$4 sm:$0xff]   ;;  %v3408_v38 = vld [vmem:[%s4864_s0 + $0x2a4] ss:$24 sps:$4 sm:$0xff]  }
  0x44   :  { %1924 = vmatprep.mubr.bf16.mxu0 %v3321_v39  ;;  %2175 = vmatprep.subr.bf16.mxu0 %v3613_v0  ;;  %v3406_v37 = vld [vmem:[%s4864_s0 + $0x278] ss:$24 sps:$4 sm:$0xff]   ;;  %v3410_v39 = vld [vmem:[%s4864_s0 + $0x2ac] ss:$24 sps:$4 sm:$0xff]  }
  0x45   :  { %3056 = vmatprep.subr.bf16.mxu1 %v3613_v0 }
  0x46   :  { %3072 = vmatpush1.bf16.msra.mxu1 %v3657_v4  ;;  %v3353_v4 = vld [vmem:[%s4864_s0 + $0x124] ss:$24 sps:$4 sm:$0xff]  }
  0x47   :  { %2176 = vmatpush1.bf16.msra.mxu0 %v3325_v40  ;;  %3057 = vmatprep.subr.bf16.mxu1 %v3613_v0  ;;  %v3412_v40 = vld [vmem:[%s4864_s0 + $0x2a0] ss:$24 sps:$4 sm:$0xff]  }
  0x48   :  { %2177 = vmatprep.subr.bf16.mxu0 %v3613_v0 }
  0x49   :  { %1636 = vmatmul.mubr.bf16.gmra.mrb[4].mxu1 %v3323_v41  ;;  %v3413_v41 = vld [vmem:[%s4864_s0 + $0x2a8] ss:$24 sps:$4 sm:$0xff]  }
  0x4a   :  { %1925 = vmatmul.mubr.bf16.gmra.mrb[4].mxu0 %v3324_v42  ;;  %1643 = vmatprep.mubr.bf16.mxu1 %v3326_v43  ;;  %v3414_v42 = vld [vmem:[%s4864_s0 + $0x2d4] ss:$24 sps:$4 sm:$0xff]  }
  0x4b   :  { %1932 = vmatprep.mubr.bf16.mxu0 %v3328_v44  ;;  %2178 = vmatpush1.bf16.msra.mxu0 %v3332_v45  ;;  %v3416_v43 = vld [vmem:[%s4864_s0 + $0x2dc] ss:$24 sps:$4 sm:$0xff]   ;;  %v3418_v44 = vld [vmem:[%s4864_s0 + $0x2d0] ss:$24 sps:$4 sm:$0xff]  }
  0x4c   :  { %2179 = vmatprep.subr.bf16.mxu0 %v3613_v0  ;;  %3073 = vmatpush1.bf16.msra.mxu1 %v3668_v6  ;;  %v3400_v6 = vld [vmem:[%s4863_s1 + $0x150] sm:$0xff]  }
  0x4d   :  { %3058 = vmatprep.subr.bf16.mxu1 %v3613_v0  ;;  %v3419_v45 = vld [vmem:[%s4864_s0 + $0x2d8] ss:$24 sps:$4 sm:$0xff]  }
  0x4f   :  { %2180 = vmatpush1.bf16.msra.mxu0 %v3343_v46  ;;  %v3421_v46 = vld [vmem:[%s4864_s0 + $0x304] ss:$24 sps:$4 sm:$0xff]  }
  0x50   :  { %2181 = vmatprep.subr.bf16.mxu0 %v3613_v0  ;;  %3074 = vmatpush1.bf16.msra.mxu1 %v3679_v8  ;;  %v3407_v8 = vld [vmem:[%s4863_s1 + $0x158] sm:$0xff]  }
  0x51   :  { %1644 = vmatmul.mubr.bf16.gmra.mrb[8].mxu1 %v3330_v47  ;;  %3059 = vmatprep.subr.bf16.mxu1 %v3613_v0  ;;  %v3425_v47 = vld [vmem:[%s4864_s0 + $0x14] ss:$24 sps:$4 sm:$0xff]  }
  0x52   :  { %1933 = vmatmul.mubr.bf16.gmra.mrb[8].mxu0 %v3331_v48  ;;  %1651 = vmatprep.mubr.bf16.mxu1 %v3333_v49  ;;  %v3426_v48 = vld [vmem:[%s4864_s0 + $0x300] ss:$24 sps:$4 sm:$0xff]   ;;  %v3423_v49 = vld [vmem:[%s4864_s0 + $0x10] ss:$24 sps:$4 sm:$0xff]  }
  0x53   :  { %1940 = vmatprep.mubr.bf16.mxu0 %v3335_v50  ;;  %2182 = vmatpush1.bf16.msra.mxu0 %v3352_v51  ;;  %v3427_v50 = vld [vmem:[%s4864_s0 + $0x334] ss:$24 sps:$4 sm:$0xff]   ;;  %v3429_v51 = vld [vmem:[%s4864_s0 + $0x44] ss:$24 sps:$4 sm:$0xff]  }
  0x54   :  { %2183 = vmatprep.subr.bf16.mxu0 %v3613_v0  ;;  %3075 = vmatpush1.bf16.msra.mxu1 %v3690_v10  ;;  %v3360_v10 = vld [vmem:[%s4864_s0 + $0x154] ss:$24 sps:$4 sm:$0xff]  }
  0x55   :  { %3060 = vmatprep.subr.bf16.mxu1 %v3613_v0 }
  0x57   :  { %2184 = vmatpush1.bf16.msra.mxu0 %v3359_v52  ;;  %v3431_v52 = vld [vmem:[%s4864_s0 + $0x330] ss:$24 sps:$4 sm:$0xff]  }
  0x58   :  { %2185 = vmatprep.subr.bf16.mxu0 %v3613_v0  ;;  %3076 = vmatpush1.bf16.msra.mxu1 %v3701_v12  ;;  %v3420_v12 = vld [vmem:[%s4863_s1 + $0x160] sm:$0xff]  }
  0x59   :  { %1652 = vmatmul.mubr.bf16.gmra.mrb[12].mxu1 %v3337_v53  ;;  %3061 = vmatprep.subr.bf16.mxu1 %v3613_v0  ;;  %v3432_v53 = vld [vmem:[%s4864_s0 + $0x40] ss:$24 sps:$4 sm:$0xff]  }
  0x5a   :  { %1941 = vmatmul.mubr.bf16.gmra.mrb[12].mxu0 %v3338_v54  ;;  %1659 = vmatprep.mubr.bf16.mxu1 %v3339_v55  ;;  %v3433_v54 = vld [vmem:[%s4864_s0 + $0x364] ss:$24 sps:$4 sm:$0xff]   ;;  %v3435_v55 = vld [vmem:[%s4864_s0 + $0x74] ss:$24 sps:$4 sm:$0xff]  }
  0x5b   :  { %1948 = vmatprep.mubr.bf16.mxu0 %v3341_v56  ;;  %2186 = vmatpush1.bf16.msra.mxu0 %v3366_v57  ;;  %v3437_v56 = vld [vmem:[%s4864_s0 + $0x360] ss:$24 sps:$4 sm:$0xff]   ;;  %v3438_v57 = vld [vmem:[%s4864_s0 + $0x70] ss:$24 sps:$4 sm:$0xff]  }
  0x5c   :  { %2187 = vmatprep.subr.bf16.mxu0 %v3613_v0  ;;  %3077 = vmatpush1.bf16.msra.mxu1 %v3712_v14  ;;  %v3365_v14 = vld [vmem:[%s4864_s0 + $0x158] ss:$24 sps:$4 sm:$0xff]  }
  0x5d   :  { %3062 = vmatprep.subr.bf16.mxu1 %v3613_v0 }
  0x5f   :  { %2188 = vmatpush1.bf16.msra.mxu0 %v3373_v58  ;;  %v3439_v58 = vld [vmem:[%s4864_s0 + $0x394] ss:$24 sps:$4 sm:$0xff]  }
  0x60   :  { %2189 = vmatprep.subr.bf16.mxu0 %v3613_v0  ;;  %3078 = vmatpush1.bf16.msra.mxu1 %v3723_v16  ;;  %v3369_v16 = vld [vmem:[%s4864_s0 + $0x18c] ss:$24 sps:$4 sm:$0xff]  }
  0x61   :  { %1660 = vmatmul.mubr.bf16.gmra.mrb[16].mxu1 %v3344_v59  ;;  %3063 = vmatprep.subr.bf16.mxu1 %v3613_v0  ;;  %v3441_v59 = vld [vmem:[%s4864_s0 + $0xa4] ss:$24 sps:$4 sm:$0xff]  }
  0x62   :  { %1949 = vmatmul.mubr.bf16.gmra.mrb[16].mxu0 %v3345_v60  ;;  %1667 = vmatprep.mubr.bf16.mxu1 %v3346_v61  ;;  %v3443_v60 = vld [vmem:[%s4864_s0 + $0x390] ss:$24 sps:$4 sm:$0xff]   ;;  %v3444_v61 = vld [vmem:[%s4864_s0 + $0xa0] ss:$24 sps:$4 sm:$0xff]  }
  0x63   :  { %1956 = vmatprep.mubr.bf16.mxu0 %v3348_v62  ;;  %2190 = vmatpush1.bf16.msra.mxu0 %v3386_v63  ;;  %v3445_v62 = vld [vmem:[%s4864_s0 + $0x3c4] ss:$24 sps:$4 sm:$0xff]   ;;  %v3447_v63 = vld [vmem:[%s4864_s0 + $0xd4] ss:$24 sps:$4 sm:$0xff]  }
  0x64   :  { %2191 = vmatprep.subr.bf16.mxu0 %v3613_v0  ;;  %3079 = vmatpush1.bf16.msra.mxu1 %v3734_v18  ;;  %v3372_v18 = vld [vmem:[%s4864_s0 + $0x188] ss:$24 sps:$4 sm:$0xff]  }
  0x65   :  { %3064 = vmatprep.subr.bf16.mxu1 %v3613_v0 }
  0x67   :  { %2192 = vmatpush1.bf16.msra.mxu0 %v3393_v1  ;;  %v3449_v1 = vld [vmem:[%s4864_s0 + $0x3c0] ss:$24 sps:$4 sm:$0xff]  }
  0x68   :  { %2193 = vmatprep.subr.bf16.mxu0 %v3613_v0  ;;  %3080 = vmatpush1.bf16.msra.mxu1 %v3751_v22  ;;  %v3379_v22 = vld [vmem:[%s4864_s0 + $0x1b8] ss:$24 sps:$4 sm:$0xff]  }
  0x69   :  { %1668 = vmatmul.mubr.bf16.gmra.mrb[20].mxu1 %v3350_v2  ;;  %3065 = vmatprep.subr.bf16.mxu1 %v3613_v0  ;;  %v3450_v2 = vld [vmem:[%s4864_s0 + $0xd0] ss:$24 sps:$4 sm:$0xff]  }
  0x6a   :  { %1957 = vmatmul.mubr.bf16.gmra.mrb[20].mxu0 %v3351_v3  ;;  %1675 = vmatprep.mubr.bf16.mxu1 %v3353_v4  ;;  %v3451_v3 = vld [vmem:[%s4864_s0 + $0x3f4] ss:$24 sps:$4 sm:$0xff]   ;;  %v3453_v4 = vld [vmem:[%s4864_s0 + $0x104] ss:$24 sps:$4 sm:$0xff]  }
  0x6b   :  { %1964 = vmatprep.mubr.bf16.mxu0 %v3355_v5  ;;  %2194 = vmatpush1.bf16.msra.mxu0 %v3400_v6  ;;  %v3455_v5 = vld [vmem:[%s4864_s0 + $0x3f0] ss:$24 sps:$4 sm:$0xff]   ;;  %v3456_v6 = vld [vmem:[%s4864_s0 + $0x100] ss:$24 sps:$4 sm:$0xff]  }
  0x6c   :  { %2195 = vmatprep.subr.bf16.mxu0 %v3613_v0  ;;  %3081 = vmatpush1.bf16.msra.mxu1 %v3762_v24  ;;  %v3384_v24 = vld [vmem:[%s4864_s0 + $0x1e0] ss:$24 sps:$4 sm:$0xff]  }
  0x6d   :  { %3066 = vmatprep.subr.bf16.mxu1 %v3613_v0 }
  0x6f   :  { %2196 = vmatpush1.bf16.msra.mxu0 %v3407_v8  ;;  %v3459_v8 = vld [vmem:[%s4864_s0 + $0x134] ss:$24 sps:$4 sm:$0xff]  }
  0x70   :  { %2197 = vmatprep.subr.bf16.mxu0 %v3613_v0  ;;  %3082 = vmatpush1.bf16.msra.mxu1 %v3773_v26  ;;  %v3387_v26 = vld [vmem:[%s4864_s0 + $0x214] ss:$24 sps:$4 sm:$0xff]  }
  0x71   :  { %1676 = vmatmul.mubr.bf16.gmra.mrb[24].mxu1 %v3357_v7  ;;  %3067 = vmatprep.subr.bf16.mxu1 %v3613_v0  ;;  %v3457_v7 = vld [vmem:[%s4864_s0 + $0x424] ss:$24 sps:$4 sm:$0xff]  }
  0x72   :  { %1965 = vmatmul.mubr.bf16.gmra.mrb[24].mxu0 %v3358_v9  ;;  %1683 = vmatprep.mubr.bf16.mxu1 %v3360_v10  ;;  %v3461_v9 = vld [vmem:[%s4864_s0 + $0x420] ss:$24 sps:$4 sm:$0xff]   ;;  %v3462_v10 = vld [vmem:[%s4864_s0 + $0x130] ss:$24 sps:$4 sm:$0xff]  }
  0x73   :  { %1972 = vmatprep.mubr.bf16.mxu0 %v3362_v11  ;;  %2198 = vmatpush1.bf16.msra.mxu0 %v3420_v12  ;;  %v3463_v11 = vld [vmem:[%s4864_s0 + $0x454] ss:$24 sps:$4 sm:$0xff]   ;;  %v3465_v12 = vld [vmem:[%s4864_s0 + $0x164] ss:$24 sps:$4 sm:$0xff]  }
  0x74   :  { %3083 = vmatpush1.bf16.msra.mxu1 %v3784_v28  ;;  %v3391_v28 = vld [vmem:[%s4864_s0 + $0x210] ss:$24 sps:$4 sm:$0xff]  }
  0x75   :  { %3068 = vmatprep.subr.bf16.mxu1 %v3613_v0 }
  0x78   :  { %3084 = vmatpush1.bf16.msra.mxu1 %v3795_v30  ;;  %v3394_v30 = vld [vmem:[%s4864_s0 + $0x244] ss:$24 sps:$4 sm:$0xff]  }
  0x79   :  { %1684 = vmatmul.mubr.bf16.gmra.mrb[28].mxu1 %v3364_v13  ;;  %3069 = vmatprep.subr.bf16.mxu1 %v3613_v0  ;;  %v3467_v13 = vld [vmem:[%s4864_s0 + $0x450] ss:$24 sps:$4 sm:$0xff]  }
  0x7a   :  { %1973 = vmatmul.mubr.bf16.gmra.mrb[28].mxu0 %v3365_v14  ;;  %1691 = vmatprep.mubr.bf16.mxu1 %v3367_v15  ;;  %v3468_v14 = vld [vmem:[%s4864_s0 + $0x160] ss:$24 sps:$4 sm:$0xff]   ;;  %v3469_v15 = vld [vmem:[%s4864_s0 + $0x484] ss:$24 sps:$4 sm:$0xff]  }
  0x7b   :  { %1980 = vmatprep.mubr.bf16.mxu0 %v3369_v16  ;;  %v3471_v16 = vld [vmem:[%s4864_s0 + $0x194] ss:$24 sps:$4 sm:$0xff]  }
  0x7c   :  { %3085 = vmatpush1.bf16.msra.mxu1 %v3806_v32  ;;  %v3398_v32 = vld [vmem:[%s4864_s0 + $0x240] ss:$24 sps:$4 sm:$0xff]  }
  0x7d   :  { %3070 = vmatprep.subr.bf16.mxu1 %v3613_v0  ;;  %v3382_v0 = vld [vmem:[%s4864_s0 + $0x1ec] ss:$24 sps:$4 sm:$0xff]  }
  0x80   :  { %3086 = vmatpush1.bf16.msra.mxu1 %v3817_v34  ;;  %v3401_v34 = vld [vmem:[%s4864_s0 + $0x274] ss:$24 sps:$4 sm:$0xff]  }
  0x81   :  { %1692 = vmatmul.mubr.bf16.gmra.mrb[32].mxu1 %v3371_v17  ;;  %v3473_v17 = vld [vmem:[%s4864_s0 + $0x480] ss:$24 sps:$4 sm:$0xff]  }
  0x82   :  { %1981 = vmatmul.mubr.bf16.gmra.mrb[32].mxu0 %v3372_v18  ;;  %1699 = vmatprep.mubr.bf16.mxu1 %v3374_v19  ;;  %v3474_v18 = vld [vmem:[%s4864_s0 + $0x190] ss:$24 sps:$4 sm:$0xff]   ;;  %v3475_v19 = vld [vmem:[%s4864_s0 + $0x4b4] ss:$24 sps:$4 sm:$0xff]  }
  0x83   :  { %1988 = vmatprep.mubr.bf16.mxu0 %v3376_v20  ;;  %v3477_v20 = vld [vmem:[%s4864_s0 + $0x1c4] ss:$24 sps:$4 sm:$0xff]  }
  0x89   :  { %1700 = vmatmul.mubr.bf16.gmra.mrb[36].mxu1 %v3378_v21  ;;  %v3479_v21 = vld [vmem:[%s4864_s0 + $0x4b0] ss:$24 sps:$4 sm:$0xff]  }
  0x8a   :  { %1989 = vmatmul.mubr.bf16.gmra.mrb[36].mxu0 %v3379_v22  ;;  %1707 = vmatprep.mubr.bf16.mxu1 %v3380_v23  ;;  %v3480_v22 = vld [vmem:[%s4864_s0 + $0x1c0] ss:$24 sps:$4 sm:$0xff]   ;;  %v3481_v23 = vld [vmem:[%s4864_s0 + $0x4e4] ss:$24 sps:$4 sm:$0xff]  }
  0x8b   :  { %1996 = vmatprep.mubr.bf16.mxu0 %v3382_v0  ;;  %v3483_v0 = vld [vmem:[%s4864_s0 + $0x1f4] ss:$24 sps:$4 sm:$0xff]  }
  0x91   :  { %1708 = vmatmul.mubr.bf16.gmra.mrb[40].mxu1 %v3384_v24  ;;  %v3485_v24 = vld [vmem:[%s4864_s0 + $0x4e0] ss:$24 sps:$4 sm:$0xff]  }
  0x92   :  { %1997 = vmatmul.mubr.bf16.gmra.mrb[40].mxu0 %v3385_v25  ;;  %1715 = vmatprep.mubr.bf16.mxu1 %v3387_v26  ;;  %v3486_v25 = vld [vmem:[%s4864_s0 + $0x1f0] ss:$24 sps:$4 sm:$0xff]   ;;  %v3487_v26 = vld [vmem:[%s4864_s0 + $0x514] ss:$24 sps:$4 sm:$0xff]  }
  0x93   :  { %2004 = vmatprep.mubr.bf16.mxu0 %v3389_v27  ;;  %v3489_v27 = vld [vmem:[%s4864_s0 + $0x224] ss:$24 sps:$4 sm:$0xff]  }
  0x99   :  { %1716 = vmatmul.mubr.bf16.gmra.mrb[44].mxu1 %v3391_v28 }
  0x9a   :  { %2005 = vmatmul.mubr.bf16.gmra.mrb[44].mxu0 %v3392_v29  ;;  %1723 = vmatprep.mubr.bf16.mxu1 %v3394_v30  ;;  %v3491_v30 = vld [vmem:[%s4864_s0 + $0x510] ss:$24 sps:$4 sm:$0xff]  }
  0x9b   :  { %2012 = vmatprep.mubr.bf16.mxu0 %v3396_v31 }
  0xa1   :  { %1724 = vmatmul.mubr.bf16.gmra.mrb[48].mxu1 %v3398_v32  ;;  %v3492_v32 = vld [vmem:[%s4864_s0 + $0x220] ss:$24 sps:$4 sm:$0xff]  }
  0xa2   :  { %2013 = vmatmul.mubr.bf16.gmra.mrb[48].mxu0 %v3399_v33  ;;  %1731 = vmatprep.mubr.bf16.mxu1 %v3401_v34  ;;  %v3493_v33 = vld [vmem:[%s4864_s0 + $0x544] ss:$24 sps:$4 sm:$0xff]  }
  0xa3   :  { %2020 = vmatprep.mubr.bf16.mxu0 %v3403_v35  ;;  %v3495_v35 = vld [vmem:[%s4864_s0 + $0x254] ss:$24 sps:$4 sm:$0xff]  }
  0xa9   :  { %1732 = vmatmul.mubr.bf16.gmra.mrb[52].mxu1 %v3405_v36 }
  0xaa   :  { %2021 = vmatmul.mubr.bf16.gmra.mrb[52].mxu0 %v3406_v37  ;;  %1739 = vmatprep.mubr.bf16.mxu1 %v3408_v38  ;;  %v3497_v38 = vld [vmem:[%s4864_s0 + $0x540] ss:$24 sps:$4 sm:$0xff]  }
  0xab   :  { %2028 = vmatprep.mubr.bf16.mxu0 %v3410_v39 }
  0xb1   :  { %1740 = vmatmul.mubr.bf16.gmra.mrb[56].mxu1 %v3412_v40  ;;  %v3498_v40 = vld [vmem:[%s4864_s0 + $0x250] ss:$24 sps:$4 sm:$0xff]  }
  0xb2   :  { %2029 = vmatmul.mubr.bf16.gmra.mrb[56].mxu0 %v3413_v41  ;;  %1747 = vmatprep.mubr.bf16.mxu1 %v3414_v42  ;;  %v3499_v41 = vld [vmem:[%s4864_s0 + $0x574] ss:$24 sps:$4 sm:$0xff]  }
  0xb3   :  { %2036 = vmatprep.mubr.bf16.mxu0 %v3416_v43  ;;  %v3501_v43 = vld [vmem:[%s4864_s0 + $0x284] ss:$24 sps:$4 sm:$0xff]  }
  0xb9   :  { %1748 = vmatmul.mubr.bf16.gmra.mrb[60].mxu1 %v3418_v44 }
  0xba   :  { %2037 = vmatmul.mubr.bf16.gmra.mrb[60].mxu0 %v3419_v45  ;;  %1755 = vmatprep.mubr.bf16.mxu1 %v3421_v46  ;;  %v3503_v46 = vld [vmem:[%s4864_s0 + $0x570] ss:$24 sps:$4 sm:$0xff]  }
  0xbb   :  { %3007 = vmatprep.mubr.msk.bf16.mxu0 %vm1498_vm0, %v3425_v47 }
  0xc1   :  { %1756 = vmatmul.mubr.bf16.gmra.mrb[64].mxu1 %v3426_v48  ;;  %v3504_v48 = vld [vmem:[%s4864_s0 + $0x280] ss:$24 sps:$4 sm:$0xff]  }
  0xc2   :  { %2206 = vmatmul.mubr.bf16.vlgmr.msra.gmra.mrb[0].mxu0 %v3423_v49  ;;  %1763 = vmatprep.mubr.bf16.mxu1 %v3427_v50  ;;  %v3505_v49 = vld [vmem:[%s4864_s0 + $0x5a4] ss:$24 sps:$4 sm:$0xff]  }
  0xc3   :  { %3008 = vmatprep.mubr.msk.bf16.mxu0 %vm1498_vm0, %v3429_v51  ;;  %v3507_v51 = vld [vmem:[%s4864_s0 + $0x2b4] ss:$24 sps:$4 sm:$0xff]  }
  0xc9   :  { %1764 = vmatmul.mubr.bf16.gmra.mrb[68].mxu1 %v3431_v52 }
  0xca   :  { %2214 = vmatmul.mubr.bf16.gmra.mrb[4].mxu0 %v3432_v53  ;;  %1771 = vmatprep.mubr.bf16.mxu1 %v3433_v54  ;;  %v3509_v54 = vld [vmem:[%s4864_s0 + $0x5a0] ss:$24 sps:$4 sm:$0xff]  }
  0xcb   :  { %3009 = vmatprep.mubr.msk.bf16.mxu0 %vm1498_vm0, %v3435_v55 }
  0xd1   :  { %1772 = vmatmul.mubr.bf16.gmra.mrb[72].mxu1 %v3437_v56  ;;  %v3510_v56 = vld [vmem:[%s4864_s0 + $0x2b0] ss:$24 sps:$4 sm:$0xff]  }
  0xd2   :  { %2222 = vmatmul.mubr.bf16.gmra.mrb[8].mxu0 %v3438_v57  ;;  %1779 = vmatprep.mubr.bf16.mxu1 %v3439_v58  ;;  %v3511_v57 = vld [vmem:[%s4864_s0 + $0x5d4] ss:$24 sps:$4 sm:$0xff]  }
  0xd3   :  { %3010 = vmatprep.mubr.msk.bf16.mxu0 %vm1498_vm0, %v3441_v59  ;;  %v3513_v59 = vld [vmem:[%s4864_s0 + $0x2e4] ss:$24 sps:$4 sm:$0xff]  }
  0xd9   :  { %1780 = vmatmul.mubr.bf16.gmra.mrb[76].mxu1 %v3443_v60 }
  0xda   :  { %2230 = vmatmul.mubr.bf16.gmra.mrb[12].mxu0 %v3444_v61  ;;  %1787 = vmatprep.mubr.bf16.mxu1 %v3445_v62  ;;  %v3515_v62 = vld [vmem:[%s4864_s0 + $0x5d0] ss:$24 sps:$4 sm:$0xff]  }
  0xdb   :  { %3011 = vmatprep.mubr.msk.bf16.mxu0 %vm1498_vm0, %v3447_v63 }
  0xe1   :  { %1788 = vmatmul.mubr.bf16.gmra.mrb[80].mxu1 %v3449_v1  ;;  %v3516_v1 = vld [vmem:[%s4864_s0 + $0x2e0] ss:$24 sps:$4 sm:$0xff]  }
  0xe2   :  { %2238 = vmatmul.mubr.bf16.gmra.mrb[16].mxu0 %v3450_v2  ;;  %1795 = vmatprep.mubr.bf16.mxu1 %v3451_v3  ;;  %v3519_v2 = vld [vmem:[%s4864_s0 + $0x30c] ss:$24 sps:$4 sm:$0xff]  }
  0xe3   :  { %3012 = vmatprep.mubr.msk.bf16.mxu0 %vm1498_vm0, %v3453_v4  ;;  %v3520_v4 = vld [vmem:[%s4864_s0 + $0x314] ss:$24 sps:$4 sm:$0xff]  }
  0xe9   :  { %1796 = vmatmul.mubr.bf16.gmra.mrb[84].mxu1 %v3455_v5 }
  0xea   :  { %2246 = vmatmul.mubr.bf16.gmra.mrb[20].mxu0 %v3456_v6  ;;  %1803 = vmatprep.mubr.bf16.mxu1 %v3457_v7  ;;  %v3517_v7 = vld [vmem:[%s4864_s0 + $0x308] ss:$24 sps:$4 sm:$0xff]  }
  0xeb   :  { %3013 = vmatprep.mubr.msk.bf16.mxu0 %vm1498_vm0, %v3459_v8 }
  0xf1   :  { %1804 = vmatmul.mubr.bf16.gmra.mrb[88].mxu1 %v3461_v9  ;;  %v3522_v9 = vld [vmem:[%s4864_s0 + $0x310] ss:$24 sps:$4 sm:$0xff]  }
  0xf2   :  { %2254 = vmatmul.mubr.bf16.gmra.mrb[24].mxu0 %v3462_v10  ;;  %1811 = vmatprep.mubr.bf16.mxu1 %v3463_v11  ;;  %v3523_v10 = vld [vmem:[%s4864_s0 + $0x33c] ss:$24 sps:$4 sm:$0xff]  }
  0xf3   :  { %3014 = vmatprep.mubr.msk.bf16.mxu0 %vm1498_vm0, %v3465_v12  ;;  %v3525_v12 = vld [vmem:[%s4864_s0 + $0x344] ss:$24 sps:$4 sm:$0xff]  }
  0xf9   :  { %1812 = vmatmul.mubr.bf16.gmra.mrb[92].mxu1 %v3467_v13 }
  0xfa   :  { %2262 = vmatmul.mubr.bf16.gmra.mrb[28].mxu0 %v3468_v14  ;;  %1819 = vmatprep.mubr.bf16.mxu1 %v3469_v15  ;;  %v3527_v15 = vld [vmem:[%s4864_s0 + $0x338] ss:$24 sps:$4 sm:$0xff]  }
  0xfb   :  { %3015 = vmatprep.mubr.msk.bf16.mxu0 %vm1498_vm0, %v3471_v16 }
 0x101   :  { %1820 = vmatmul.mubr.bf16.gmra.mrb[96].mxu1 %v3473_v17  ;;  %v3528_v17 = vld [vmem:[%s4864_s0 + $0x340] ss:$24 sps:$4 sm:$0xff]  }
 0x102   :  { %2270 = vmatmul.mubr.bf16.gmra.mrb[32].mxu0 %v3474_v18  ;;  %1827 = vmatprep.mubr.bf16.mxu1 %v3475_v19  ;;  %v3529_v18 = vld [vmem:[%s4864_s0 + $0x36c] ss:$24 sps:$4 sm:$0xff]  }
 0x103   :  { %3016 = vmatprep.mubr.msk.bf16.mxu0 %vm1498_vm0, %v3477_v20  ;;  %v3531_v20 = vld [vmem:[%s4864_s0 + $0x374] ss:$24 sps:$4 sm:$0xff]  }
 0x109   :  { %1828 = vmatmul.mubr.bf16.gmra.mrb[100].mxu1 %v3479_v21 }
 0x10a   :  { %2278 = vmatmul.mubr.bf16.gmra.mrb[36].mxu0 %v3480_v22  ;;  %1835 = vmatprep.mubr.bf16.mxu1 %v3481_v23  ;;  %v3533_v23 = vld [vmem:[%s4864_s0 + $0x368] ss:$24 sps:$4 sm:$0xff]  }
 0x10b   :  { %3017 = vmatprep.mubr.msk.bf16.mxu0 %vm1498_vm0, %v3483_v0 }
 0x111   :  { %1836 = vmatmul.mubr.bf16.gmra.mrb[104].mxu1 %v3485_v24  ;;  %v3534_v24 = vld [vmem:[%s4864_s0 + $0x370] ss:$24 sps:$4 sm:$0xff]  }
 0x112   :  { %2286 = vmatmul.mubr.bf16.gmra.mrb[40].mxu0 %v3486_v25  ;;  %1843 = vmatprep.mubr.bf16.mxu1 %v3487_v26  ;;  %v3535_v25 = vld [vmem:[%s4864_s0 + $0x39c] ss:$24 sps:$4 sm:$0xff]  }
 0x113   :  { %3018 = vmatprep.mubr.msk.bf16.mxu0 %vm1498_vm0, %v3489_v27  ;;  %v3537_v27 = vld [vmem:[%s4864_s0 + $0x3a4] ss:$24 sps:$4 sm:$0xff]  }
 0x114   :  { %v4241_v28 = vpop.f32.mrb[0].mxu1 }
 0x115   :  { %v1631_v29 = vpop.f32.mrb[1].mxu1 }
 0x116   :  { %v4246_v31 = vpop.f32.mrb[2].mxu1 }
 0x117   :  { %v1634_v34 = vpop.f32.mrb[3].mxu1 }
 0x118   :  { %v3540_v34 = vld [vmem:[%s4864_s0 + $0x3a0] ss:$24 sps:$4 sm:$0xff]  }
 0x119   :  { %1844 = vmatmul.mubr.bf16.gmra.mrb[108].mxu1 %v3491_v30 }
 0x11a   :  { %2294 = vmatmul.mubr.bf16.gmra.mrb[44].mxu0 %v3492_v32  ;;  %1851 = vmatprep.mubr.bf16.mxu1 %v3493_v33  ;;  %v3539_v32 = vld [vmem:[%s4864_s0 + $0x398] ss:$24 sps:$4 sm:$0xff]  }
 0x11b   :  { %3019 = vmatprep.mubr.msk.bf16.mxu0 %vm1498_vm0, %v3495_v35  ;;  %v3541_v35 = vld [vmem:[%s4864_s0 + $0x3cc] ss:$24 sps:$4 sm:$0xff]  }
 0x11c   :  { %v4258_v36 = vpop.f32.mrb[4].mxu1 }
 0x11d   :  { %v1639_v37 = vpop.f32.mrb[5].mxu1 }
 0x11e   :  { %v4263_v39 = vpop.f32.mrb[6].mxu1 }
 0x11f   :  { %v1642_v42 = vpop.f32.mrb[7].mxu1 }
 0x120   :  { %v3545_v42 = vld [vmem:[%s4864_s0 + $0x3c8] ss:$24 sps:$4 sm:$0xff]  }
 0x121   :  { %1852 = vmatmul.mubr.bf16.gmra.mrb[112].mxu1 %v3497_v38  ;;  %v3543_v38 = vld [vmem:[%s4864_s0 + $0x3d4] ss:$24 sps:$4 sm:$0xff]  }
 0x122   :  { %2302 = vmatmul.mubr.bf16.gmra.mrb[48].mxu0 %v3498_v40  ;;  %1859 = vmatprep.mubr.bf16.mxu1 %v3499_v41 }
 0x123   :  { %3020 = vmatprep.mubr.msk.bf16.mxu0 %vm1498_vm0, %v3501_v43 }
 0x124   :  { %v4275_v44 = vpop.f32.mrb[8].mxu1 }
 0x125   :  { %v1647_v45 = vpop.f32.mrb[9].mxu1 }
 0x126   :  { %v4280_v47 = vpop.f32.mrb[10].mxu1  ;;  %v3546_v45 = vld [vmem:[%s4864_s0 + $0x3d0] ss:$24 sps:$4 sm:$0xff]  }
 0x127   :  { %v1650_v50 = vpop.f32.mrb[11].mxu1 }
 0x129   :  { %1860 = vmatmul.mubr.bf16.gmra.mrb[116].mxu1 %v3503_v46  ;;  %v3547_v46 = vld [vmem:[%s4864_s0 + $0x3fc] ss:$24 sps:$4 sm:$0xff]  }
 0x12a   :  { %2310 = vmatmul.mubr.bf16.gmra.mrb[52].mxu0 %v3504_v48  ;;  %1867 = vmatprep.mubr.bf16.mxu1 %v3505_v49  ;;  %v3549_v49 = vld [vmem:[%s4864_s0 + $0x404] ss:$24 sps:$4 sm:$0xff]  }
 0x12b   :  { %3021 = vmatprep.mubr.msk.bf16.mxu0 %vm1498_vm0, %v3507_v51 }
 0x12c   :  { %v4292_v52 = vpop.f32.mrb[12].mxu1 }
 0x12d   :  { %v1655_v53 = vpop.f32.mrb[13].mxu1 }
 0x12e   :  { %v4297_v55 = vpop.f32.mrb[14].mxu1  ;;  %v3551_v53 = vld [vmem:[%s4864_s0 + $0x3f8] ss:$24 sps:$4 sm:$0xff]  }
 0x12f   :  { %v1658_v58 = vpop.f32.mrb[15].mxu1 }
 0x131   :  { %1868 = vmatmul.mubr.bf16.gmra.mrb[120].mxu1 %v3509_v54 }
 0x132   :  { %2318 = vmatmul.mubr.bf16.gmra.mrb[56].mxu0 %v3510_v56  ;;  %1875 = vmatprep.mubr.bf16.mxu1 %v3511_v57  ;;  %v3552_v56 = vld [vmem:[%s4864_s0 + $0x400] ss:$24 sps:$4 sm:$0xff]   ;;  %v3553_v57 = vld [vmem:[%s4864_s0 + $0x42c] ss:$24 sps:$4 sm:$0xff]  }
 0x133   :  { %3022 = vmatprep.mubr.msk.bf16.mxu0 %vm1498_vm0, %v3513_v59  ;;  %v3555_v59 = vld [vmem:[%s4864_s0 + $0x434] ss:$24 sps:$4 sm:$0xff]  }
 0x134   :  { %v4309_v60 = vpop.f32.mrb[16].mxu1 }
 0x135   :  { %v1663_v61 = vpop.f32.mrb[17].mxu1 }
 0x136   :  { %v4314_v63 = vpop.f32.mrb[18].mxu1 }
 0x137   :  { %v1666_v3 = vpop.f32.mrb[19].mxu1 }
 0x138   :  { %v3558_v3 = vld [vmem:[%s4864_s0 + $0x430] ss:$24 sps:$4 sm:$0xff]  }
 0x139   :  { %1876 = vmatmul.mubr.bf16.gmra.mrb[124].mxu1 %v3515_v62 }
 0x13a   :  { %2326 = vmatmul.mubr.bf16.gmra.mrb[60].mxu0 %v3516_v1  ;;  %2044 = vmatprep.mubr.bf16.mxu1 %v3519_v2  ;;  %v3557_v1 = vld [vmem:[%s4864_s0 + $0x428] ss:$24 sps:$4 sm:$0xff]  }
 0x13b   :  { %3023 = vmatprep.mubr.msk.bf16.mxu0 %vm1498_vm0, %v3520_v4  ;;  %v3559_v4 = vld [vmem:[%s4864_s0 + $0x45c] ss:$24 sps:$4 sm:$0xff]  }
 0x13c   :  { %v4326_v5 = vpop.f32.mrb[20].mxu1 }
 0x13d   :  { %v1671_v6 = vpop.f32.mrb[21].mxu1 }
 0x13e   :  { %v4331_v8 = vpop.f32.mrb[22].mxu1 }
 0x13f   :  { %v1674_v11 = vpop.f32.mrb[23].mxu1 }
 0x140   :  { %v3563_v11 = vld [vmem:[%s4864_s0 + $0x458] ss:$24 sps:$4 sm:$0xff]  }
 0x141   :  { %2045 = vmatmul.mubr.bf16.vlgmr.msra.gmra.mrb[64].mxu1 %v3517_v7  ;;  %v3561_v7 = vld [vmem:[%s4864_s0 + $0x464] ss:$24 sps:$4 sm:$0xff]  }
 0x142   :  { %2334 = vmatmul.mubr.bf16.gmra.mrb[64].mxu0 %v3522_v9  ;;  %2052 = vmatprep.mubr.bf16.mxu1 %v3523_v10 }
 0x143   :  { %3024 = vmatprep.mubr.msk.bf16.mxu0 %vm1498_vm0, %v3525_v12 }
 0x144   :  { %v4343_v13 = vpop.f32.mrb[24].mxu1 }
 0x145   :  { %v1679_v14 = vpop.f32.mrb[25].mxu1 }
 0x146   :  { %v4348_v16 = vpop.f32.mrb[26].mxu1  ;;  %v3564_v14 = vld [vmem:[%s4864_s0 + $0x460] ss:$24 sps:$4 sm:$0xff]  }
 0x147   :  { %v1682_v19 = vpop.f32.mrb[27].mxu1 }
 0x149   :  { %2053 = vmatmul.mubr.bf16.gmra.mrb[68].mxu1 %v3527_v15  ;;  %v3565_v15 = vld [vmem:[%s4864_s0 + $0x48c] ss:$24 sps:$4 sm:$0xff]  }
 0x14a   :  { %2342 = vmatmul.mubr.bf16.gmra.mrb[68].mxu0 %v3528_v17  ;;  %2060 = vmatprep.mubr.bf16.mxu1 %v3529_v18  ;;  %v3567_v18 = vld [vmem:[%s4864_s0 + $0x494] ss:$24 sps:$4 sm:$0xff]  }
 0x14b   :  { %3025 = vmatprep.mubr.msk.bf16.mxu0 %vm1498_vm0, %v3531_v20 }
 0x14c   :  { %v4360_v21 = vpop.f32.mrb[28].mxu1 }
 0x14d   :  { %v1687_v22 = vpop.f32.mrb[29].mxu1 }
 0x14e   :  { %v4365_v0 = vpop.f32.mrb[30].mxu1  ;;  %v3569_v22 = vld [vmem:[%s4864_s0 + $0x488] ss:$24 sps:$4 sm:$0xff]  }
 0x14f   :  { %v1690_v26 = vpop.f32.mrb[31].mxu1 }
 0x151   :  { %2061 = vmatmul.mubr.bf16.gmra.mrb[72].mxu1 %v3533_v23 }
 0x152   :  { %2350 = vmatmul.mubr.bf16.gmra.mrb[72].mxu0 %v3534_v24  ;;  %2068 = vmatprep.mubr.bf16.mxu1 %v3535_v25  ;;  %v3570_v24 = vld [vmem:[%s4864_s0 + $0x490] ss:$24 sps:$4 sm:$0xff]   ;;  %v3571_v25 = vld [vmem:[%s4864_s0 + $0x4bc] ss:$24 sps:$4 sm:$0xff]  }
 0x153   :  { %3026 = vmatprep.mubr.msk.bf16.mxu0 %vm1498_vm0, %v3537_v27  ;;  %v3573_v27 = vld [vmem:[%s4864_s0 + $0x4c4] ss:$24 sps:$4 sm:$0xff]  }
 0x154   :  { %v4377_v29 = vpop.f32.mrb[32].mxu1 }
 0x155   :  { %v1695_v30 = vpop.f32.mrb[33].mxu1 }
 0x156   :  { %v4382_v33 = vpop.f32.mrb[34].mxu1 }
 0x157   :  { %v1698_v37 = vpop.f32.mrb[35].mxu1 }
 0x158   :  { %v3576_v37 = vld [vmem:[%s4864_s0 + $0x4c0] ss:$24 sps:$4 sm:$0xff]  }
 0x159   :  { %2069 = vmatmul.mubr.bf16.gmra.mrb[76].mxu1 %v3539_v32 }
 0x15a   :  { %2358 = vmatmul.mubr.bf16.gmra.mrb[76].mxu0 %v3540_v34  ;;  %2076 = vmatprep.mubr.bf16.mxu1 %v3541_v35  ;;  %v3575_v34 = vld [vmem:[%s4864_s0 + $0x4b8] ss:$24 sps:$4 sm:$0xff]  }
 0x15b   :  { %3027 = vmatprep.mubr.msk.bf16.mxu0 %vm1498_vm0, %v3543_v38  ;;  %v3577_v38 = vld [vmem:[%s4864_s0 + $0x4ec] ss:$24 sps:$4 sm:$0xff]  }
 0x15c   :  { %v4394_v40 = vpop.f32.mrb[36].mxu1 }
 0x15d   :  { %v1703_v41 = vpop.f32.mrb[37].mxu1 }
 0x15e   :  { %v4399_v43 = vpop.f32.mrb[38].mxu1 }
 0x15f   :  { %v1706_v48 = vpop.f32.mrb[39].mxu1 }
 0x160   :  { %v3581_v48 = vld [vmem:[%s4864_s0 + $0x4e8] ss:$24 sps:$4 sm:$0xff]  }
 0x161   :  { %2077 = vmatmul.mubr.bf16.gmra.mrb[80].mxu1 %v3545_v42  ;;  %v3579_v42 = vld [vmem:[%s4864_s0 + $0x4f4] ss:$24 sps:$4 sm:$0xff]  }
 0x162   :  { %2366 = vmatmul.mubr.bf16.gmra.mrb[80].mxu0 %v3546_v45  ;;  %2084 = vmatprep.mubr.bf16.mxu1 %v3547_v46 }
 0x163   :  { %3028 = vmatprep.mubr.msk.bf16.mxu0 %vm1498_vm0, %v3549_v49 }
 0x164   :  { %v4411_v50 = vpop.f32.mrb[40].mxu1 }
 0x165   :  { %v1711_v51 = vpop.f32.mrb[41].mxu1 }
 0x166   :  { %v4416_v54 = vpop.f32.mrb[42].mxu1  ;;  %v3582_v51 = vld [vmem:[%s4864_s0 + $0x4f0] ss:$24 sps:$4 sm:$0xff]  }
 0x167   :  { %v1714_v58 = vpop.f32.mrb[43].mxu1 }
 0x169   :  { %2085 = vmatmul.mubr.bf16.gmra.mrb[84].mxu1 %v3551_v53  ;;  %v3583_v53 = vld [vmem:[%s4864_s0 + $0x51c] ss:$24 sps:$4 sm:$0xff]  }
 0x16a   :  { %2374 = vmatmul.mubr.bf16.gmra.mrb[84].mxu0 %v3552_v56  ;;  %2092 = vmatprep.mubr.bf16.mxu1 %v3553_v57  ;;  %v3585_v57 = vld [vmem:[%s4864_s0 + $0x524] ss:$24 sps:$4 sm:$0xff]  }
 0x16b   :  { %3029 = vmatprep.mubr.msk.bf16.mxu0 %vm1498_vm0, %v3555_v59  ;;  %v4516_v59 = vld [vmem:[%s4865_s2] ss:$0 sm:$0xff] }
 0x16c   :  { %v4428_v61 = vpop.f32.mrb[44].mxu1 }
 0x16d   :  { %v1719_v62 = vpop.f32.mrb[45].mxu1 }
 0x16e   :  { %v4433_v2 = vpop.f32.mrb[46].mxu1  ;;  %v3587_v62 = vld [vmem:[%s4864_s0 + $0x518] ss:$24 sps:$4 sm:$0xff]  }
 0x16f   :  { %v1722_v6 = vpop.f32.mrb[47].mxu1 }
 0x170   :  { %v3589_v6 = vld [vmem:[%s4864_s0 + $0x54c] ss:$24 sps:$4 sm:$0xff]  }
 0x171   :  { %2093 = vmatmul.mubr.bf16.gmra.mrb[88].mxu1 %v3557_v1 }
 0x172   :  { %2382 = vmatmul.mubr.bf16.gmra.mrb[88].mxu0 %v3558_v3  ;;  %2100 = vmatprep.mubr.bf16.mxu1 %v3559_v4  ;;  %v3588_v4 = vld [vmem:[%s4864_s0 + $0x520] ss:$24 sps:$4 sm:$0xff]  }
 0x173   :  { %3030 = vmatprep.mubr.msk.bf16.mxu0 %vm1498_vm0, %v3561_v7  ;;  %v4531_v7 = vld [vmem:[%s4866_s3] ss:$0 sm:$0xff] }
 0x174   :  { %v4445_v9 = vpop.f32.mrb[48].mxu1 }
 0x175   :  { %v1727_v10 = vpop.f32.mrb[49].mxu1 }
 0x176   :  { %v4450_v12 = vpop.f32.mrb[50].mxu1 }
 0x177   :  { %v1730_v17 = vpop.f32.mrb[51].mxu1 }
 0x179   :  { %2101 = vmatmul.mubr.bf16.gmra.mrb[92].mxu1 %v3563_v11  ;;  %v3591_v11 = vld [vmem:[%s4864_s0 + $0x554] ss:$24 sps:$4 sm:$0xff]  }
 0x17a   :  { %2390 = vmatmul.mubr.bf16.gmra.mrb[92].mxu0 %v3564_v14  ;;  %2108 = vmatprep.mubr.bf16.mxu1 %v3565_v15 }
 0x17b   :  { %3031 = vmatprep.mubr.msk.bf16.mxu0 %vm1498_vm0, %v3567_v18 }
 0x17c   :  { %v4462_v19 = vpop.f32.mrb[52].mxu1 }
 0x17d   :  { %v1735_v20 = vpop.f32.mrb[53].mxu1 }
 0x17e   :  { %v4467_v23 = vpop.f32.mrb[54].mxu1 }
 0x17f   :  { %v1738_v26 = vpop.f32.mrb[55].mxu1 }
 0x180   :  { %v3594_v26 = vld [vmem:[%s4864_s0 + $0x550] ss:$24 sps:$4 sm:$0xff]  }
 0x181   :  { %2109 = vmatmul.mubr.bf16.gmra.mrb[96].mxu1 %v3569_v22 }
 0x182   :  { %2398 = vmatmul.mubr.bf16.gmra.mrb[96].mxu0 %v3570_v24  ;;  %2116 = vmatprep.mubr.bf16.mxu1 %v3571_v25 }
 0x183   :  { %3032 = vmatprep.mubr.msk.bf16.mxu0 %vm1498_vm0, %v3573_v27  ;;  %v3595_v27 = vld [vmem:[%s4864_s0 + $0x57c] ss:$24 sps:$4 sm:$0xff]  }
 0x184   :  { %v4479_v30 = vpop.f32.mrb[56].mxu1 }
 0x185   :  { %v1743_v32 = vpop.f32.mrb[57].mxu1 }
 0x186   :  { %v4484_v35 = vpop.f32.mrb[58].mxu1 }
 0x187   :  { %v1746_v41 = vpop.f32.mrb[59].mxu1 }
 0x189   :  { %2117 = vmatmul.mubr.bf16.gmra.mrb[100].mxu1 %v3575_v34  ;;  %v3597_v34 = vld [vmem:[%s4864_s0 + $0x584] ss:$24 sps:$4 sm:$0xff]  }
 0x18a   :  { %2406 = vmatmul.mubr.bf16.gmra.mrb[100].mxu0 %v3576_v37  ;;  %2124 = vmatprep.mubr.bf16.mxu1 %v3577_v38 }
 0x18b   :  { %3033 = vmatprep.mubr.msk.bf16.mxu0 %vm1498_vm0, %v3579_v42 }
 0x18c   :  { %v4496_v45 = vpop.f32.mrb[60].mxu1 }
 0x18d   :  { %v1751_v46 = vpop.f32.mrb[61].mxu1 }
 0x18e   :  { %v4501_v49 = vpop.f32.mrb[62].mxu1 }
 0x18f   :  { %v1754_v56 = vpop.f32.mrb[63].mxu1 }
 0x190   :  { %v3600_v56 = vld [vmem:[%s4864_s0 + $0x580] ss:$24 sps:$4 sm:$0xff]  }
 0x191   :  { %2125 = vmatmul.mubr.bf16.gmra.mrb[104].mxu1 %v3581_v48 }
 0x192   :  { %2414 = vmatmul.mubr.bf16.gmra.mrb[104].mxu0 %v3582_v51  ;;  %2132 = vmatprep.mubr.bf16.mxu1 %v3583_v53 }
 0x193   :  { %3034 = vmatprep.mubr.msk.bf16.mxu0 %vm1498_vm0, %v3585_v57  ;;  %v3601_v57 = vld [vmem:[%s4864_s0 + $0x5ac] ss:$24 sps:$4 sm:$0xff]  }
 0x195   :  { %v2207_v58 = vpop.f32.mrb[0].mxu0 }
 0x196   :  { %v3087_v1 = vadd.f32 %v2207_v58, %v4241_v28  ;;  %v2209_v3 = vpop.f32.mrb[1].mxu0 }
 0x197   :  { %v2210_v10 = vpop.f32.mrb[2].mxu0 }
 0x198   :  { %v2518_v28 = vmul.f32 %v3087_v1, %v4516_v59  ;;  %v3088_v14 = vadd.f32 %v2210_v10, %v4246_v31  ;;  %v2212_v15 = vpop.f32.mrb[3].mxu0  ;;  %v3593_v31 = vld [vmem:[%s4864_s0 + $0x548] ss:$24 sps:$4 sm:$0xff]  }
 0x199   :  { %2133 = vmatmul.mubr.bf16.gmra.mrb[108].mxu1 %v3587_v62  ;;  %v3603_v62 = vld [vmem:[%s4864_s0 + $0x5b4] ss:$24 sps:$4 sm:$0xff]   ;;  %v3606_v15 = vld [vmem:[%s4864_s0 + $0x5b0] ss:$24 sps:$4 sm:$0xff]  }
 0x19a   :  { %v2638_v17 = vadd.f32 %v4531_v7, %v2518_v28  ;;  %v2519_v18 = vmul.f32 %v3088_v14, %v4516_v59  ;;  %2422 = vmatmul.mubr.bf16.gmra.mrb[108].mxu0 %v3588_v4  ;;  %2140 = vmatprep.mubr.bf16.mxu1 %v3589_v6 }
 0x19b   :  { %3035 = vmatprep.mubr.msk.bf16.mxu0 %vm1498_vm0, %v3591_v11 }
 0x19c   :  { %2702 = vst [vmem:[%s4867_s4] sm:$0xff] %v2638_v17  ;;  %v2639_v20 = vadd.f32 %v4531_v7, %v2519_v18  ;;  %v3607_v17 = vld [vmem:[%s4864_s0 + $0x5dc] ss:$24 sps:$4 sm:$0xff]  }
 0x19d   :  { %v2215_v22 = vpop.f32.mrb[4].mxu0 }
 0x19e   :  { %2703 = vst [vmem:[%s4867_s4 + $0x8] sm:$0xff] %v2639_v20  ;;  %v3089_v24 = vadd.f32 %v2215_v22, %v4258_v36  ;;  %v2217_v25 = vpop.f32.mrb[5].mxu0  ;;  %v3609_v20 = vld [vmem:[%s4864_s0 + $0x5e4] ss:$24 sps:$4 sm:$0xff]  }
 0x19f   :  { %v2218_v32 = vpop.f32.mrb[6].mxu0 }
 0x1a0   :  { %v2520_v37 = vmul.f32 %v3089_v24, %v4516_v59  ;;  %v3090_v38 = vadd.f32 %v2218_v32, %v4263_v39  ;;  %v2220_v41 = vpop.f32.mrb[7].mxu0  ;;  %v3599_v39 = vld [vmem:[%s4864_s0 + $0x578] ss:$24 sps:$4 sm:$0xff]  }
 0x1a1   :  { %2141 = vmatmul.mubr.bf16.gmra.mrb[112].mxu1 %v3593_v31  ;;  %v3611_v32 = vld [vmem:[%s4864_s0 + $0x5d8] ss:$24 sps:$4 sm:$0xff]  }
 0x1a2   :  { %v2640_v36 = vadd.f32 %v4531_v7, %v2520_v37  ;;  %v2521_v42 = vmul.f32 %v3090_v38, %v4516_v59  ;;  %2430 = vmatmul.mubr.bf16.gmra.mrb[112].mxu0 %v3594_v26  ;;  %2148 = vmatprep.mubr.bf16.mxu1 %v3595_v27  ;;  %v3048_v37 = vld [vmem:[%s4866_s3 + $0x1] ss:$0 sm:$0xff] }
 0x1a3   :  { %3036 = vmatprep.mubr.msk.bf16.mxu0 %vm1498_vm0, %v3597_v34 }
 0x1a4   :  { %2704 = vst [vmem:[%s4867_s4 + $0x10] sm:$0xff] %v2640_v36  ;;  %v2641_v46 = vadd.f32 %v4531_v7, %v2521_v42 }
 0x1a5   :  { %v2223_v48 = vpop.f32.mrb[8].mxu0 }
 0x1a6   :  { %2705 = vst [vmem:[%s4867_s4 + $0x18] sm:$0xff] %v2641_v46  ;;  %v3091_v51 = vadd.f32 %v2223_v48, %v4275_v44  ;;  %v2225_v53 = vpop.f32.mrb[9].mxu0 }
 0x1a7   :  { %v2226_v58 = vpop.f32.mrb[10].mxu0 }
 0x1a8   :  { %v2522_v1 = vmul.f32 %v3091_v51, %v4516_v59  ;;  %v3092_v3 = vadd.f32 %v2226_v58, %v4280_v47  ;;  %v2228_v4 = vpop.f32.mrb[11].mxu0  ;;  %v3605_v47 = vld [vmem:[%s4864_s0 + $0x5a8] ss:$24 sps:$4 sm:$0xff]  }
 0x1a9   :  { %2149 = vmatmul.mubr.bf16.gmra.mrb[116].mxu1 %v3599_v39 }
 0x1aa   :  { %v2642_v44 = vadd.f32 %v4531_v7, %v2522_v1  ;;  %v2523_v6 = vmul.f32 %v3092_v3, %v4516_v59  ;;  %2438 = vmatmul.mubr.bf16.gmra.mrb[116].mxu0 %v3600_v56  ;;  %2156 = vmatprep.mubr.bf16.mxu1 %v3601_v57 }
 0x1ab   :  { %3037 = vmatprep.mubr.msk.bf16.mxu0 %vm1498_vm0, %v3603_v62 }
 0x1ac   :  { %2706 = vst [vmem:[%s4867_s4 + $0x20] sm:$0xff] %v2642_v44  ;;  %v2643_v10 = vadd.f32 %v4531_v7, %v2523_v6 }
 0x1ad   :  { %v2231_v11 = vpop.f32.mrb[12].mxu0 }
 0x1ae   :  { %2707 = vst [vmem:[%s4867_s4 + $0x28] sm:$0xff] %v2643_v10  ;;  %v3093_v28 = vadd.f32 %v2231_v11, %v4292_v52  ;;  %v2233_v14 = vpop.f32.mrb[13].mxu0 }
 0x1af   :  { %v2234_v18 = vpop.f32.mrb[14].mxu0 }
 0x1b0   :  { %v2524_v22 = vmul.f32 %v3093_v28, %v4516_v59  ;;  %v3094_v31 = vadd.f32 %v2234_v18, %v4297_v55  ;;  %v2236_v24 = vpop.f32.mrb[15].mxu0  ;;  %v3040_v55 = vld [vmem:[%s4865_s2 + $0x1] ss:$0 sm:$0xff] }
 0x1b1   :  { %2157 = vmatmul.mubr.bf16.gmra.mrb[120].mxu1 %v3605_v47 }
 0x1b2   :  { %v2644_v52 = vadd.f32 %v4531_v7, %v2524_v22  ;;  %v2525_v25 = vmul.f32 %v3094_v31, %v4516_v59  ;;  %2446 = vmatmul.mubr.bf16.gmra.mrb[120].mxu0 %v3606_v15  ;;  %2164 = vmatprep.mubr.bf16.mxu1 %v3607_v17 }
 0x1b3   :  { %3038 = vmatprep.mubr.msk.bf16.mxu0 %vm1498_vm0, %v3609_v20 }
 0x1b4   :  { %2708 = vst [vmem:[%s4867_s4 + $0x30] sm:$0xff] %v2644_v52  ;;  %v2645_v26 = vadd.f32 %v4531_v7, %v2525_v25  ;;  %v3612_v7 = vld [vmem:[%s4864_s0 + $0x5e0] ss:$24 sps:$4 sm:$0xff]  }
 0x1b5   :  { %v2239_v27 = vpop.f32.mrb[16].mxu0 }
 0x1b6   :  { %2709 = vst [vmem:[%s4867_s4 + $0x38] sm:$0xff] %v2645_v26  ;;  %v3095_v59 = vadd.f32 %v2239_v27, %v4309_v60  ;;  %v2241_v34 = vpop.f32.mrb[17].mxu0  ;;  %v3041_v26 = vld [vmem:[%s4865_s2 + $0x2] ss:$0 sm:$0xff] }
 0x1b7   :  { %v2242_v38 = vpop.f32.mrb[18].mxu0  ;;  %v3049_v27 = vld [vmem:[%s4866_s3 + $0x2] ss:$0 sm:$0xff] }
 0x1b8   :  { %v2526_v41 = vmul.f32 %v3095_v59, %v3040_v55  ;;  %v3096_v36 = vadd.f32 %v2242_v38, %v4314_v63  ;;  %v2244_v42 = vpop.f32.mrb[19].mxu0 }
 0x1b9   :  { %2165 = vmatmul.mubr.bf16.gmra.mrb[124].mxu1 %v3611_v32 }
 0x1ba   :  { %v2646_v46 = vadd.f32 %v3048_v37, %v2526_v41  ;;  %v2527_v48 = vmul.f32 %v3096_v36, %v3040_v55  ;;  %2454 = vmatmul.mubr.bf16.gmra.mrb[124].mxu0 %v3612_v7 }
 0x1bc   :  { %2710 = vst [vmem:[%s4867_s4 + $0x40] sm:$0xff] %v2646_v46  ;;  %v2647_v60 = vadd.f32 %v3048_v37, %v2527_v48 }
 0x1bd   :  { %v2247_v39 = vpop.f32.mrb[20].mxu0 }
 0x1be   :  { %2711 = vst [vmem:[%s4867_s4 + $0x48] sm:$0xff] %v2647_v60  ;;  %v3097_v51 = vadd.f32 %v2247_v39, %v4326_v5  ;;  %v2249_v53 = vpop.f32.mrb[21].mxu0 }
 0x1bf   :  { %v2250_v56 = vpop.f32.mrb[22].mxu0 }
 0x1c0   :  { %v2528_v63 = vmul.f32 %v3097_v51, %v3040_v55  ;;  %v3098_v57 = vadd.f32 %v2250_v56, %v4331_v8  ;;  %v2252_v58 = vpop.f32.mrb[23].mxu0 }
 0x1c2   :  { %v2648_v62 = vadd.f32 %v3048_v37, %v2528_v63  ;;  %v2529_v1 = vmul.f32 %v3098_v57, %v3040_v55 }
 0x1c4   :  { %2712 = vst [vmem:[%s4867_s4 + $0x50] sm:$0xff] %v2648_v62  ;;  %v2649_v3 = vadd.f32 %v3048_v37, %v2529_v1 }
 0x1c5   :  { %v2255_v4 = vpop.f32.mrb[24].mxu0 }
 0x1c6   :  { %2713 = vst [vmem:[%s4867_s4 + $0x58] sm:$0xff] %v2649_v3  ;;  %v3099_v5 = vadd.f32 %v2255_v4, %v4343_v13  ;;  %v2257_v44 = vpop.f32.mrb[25].mxu0 }
 0x1c7   :  { %v2258_v6 = vpop.f32.mrb[26].mxu0 }
 0x1c8   :  { %v2530_v10 = vmul.f32 %v3099_v5, %v3040_v55  ;;  %v3100_v8 = vadd.f32 %v2258_v6, %v4348_v16  ;;  %v2260_v11 = vpop.f32.mrb[27].mxu0 }
 0x1ca   :  { %v2650_v47 = vadd.f32 %v3048_v37, %v2530_v10  ;;  %v2531_v28 = vmul.f32 %v3100_v8, %v3040_v55 }
 0x1cc   :  { %2714 = vst [vmem:[%s4867_s4 + $0x60] sm:$0xff] %v2650_v47  ;;  %v2651_v14 = vadd.f32 %v3048_v37, %v2531_v28 }
 0x1cd   :  { %v2263_v15 = vpop.f32.mrb[28].mxu0 }
 0x1ce   :  { %2715 = vst [vmem:[%s4867_s4 + $0x68] sm:$0xff] %v2651_v14  ;;  %v3101_v13 = vadd.f32 %v2263_v15, %v4360_v21  ;;  %v2265_v17 = vpop.f32.mrb[29].mxu0  ;;  %v3042_v14 = vld [vmem:[%s4865_s2 + $0x3] ss:$0 sm:$0xff] }
 0x1cf   :  { %v2266_v18 = vpop.f32.mrb[30].mxu0  ;;  %v3050_v15 = vld [vmem:[%s4866_s3 + $0x3] ss:$0 sm:$0xff] }
 0x1d0   :  { %v2532_v20 = vmul.f32 %v3101_v13, %v3040_v55  ;;  %v3102_v16 = vadd.f32 %v2266_v18, %v4365_v0  ;;  %v2268_v22 = vpop.f32.mrb[31].mxu0 }
 0x1d2   :  { %v2652_v31 = vadd.f32 %v3048_v37, %v2532_v20  ;;  %v2533_v24 = vmul.f32 %v3102_v16, %v3040_v55 }
 0x1d4   :  { %2716 = vst [vmem:[%s4867_s4 + $0x70] sm:$0xff] %v2652_v31  ;;  %v2653_v52 = vadd.f32 %v3048_v37, %v2533_v24 }
 0x1d5   :  { %v2271_v25 = vpop.f32.mrb[32].mxu0 }
 0x1d6   :  { %2717 = vst [vmem:[%s4867_s4 + $0x78] sm:$0xff] %v2653_v52  ;;  %v3103_v21 = vadd.f32 %v2271_v25, %v4377_v29  ;;  %v2273_v0 = vpop.f32.mrb[33].mxu0 }
 0x1d7   :  { %v2274_v55 = vpop.f32.mrb[34].mxu0 }
 0x1d8   :  { %v2534_v32 = vmul.f32 %v3103_v21, %v3041_v26  ;;  %v3104_v59 = vadd.f32 %v2274_v55, %v4382_v33  ;;  %v2276_v34 = vpop.f32.mrb[35].mxu0 }
 0x1da   :  { %v2654_v7 = vadd.f32 %v3049_v27, %v2534_v32  ;;  %v2535_v37 = vmul.f32 %v3104_v59, %v3041_v26 }
 0x1dc   :  { %2718 = vst [vmem:[%s4867_s4 + $0x80] sm:$0xff] %v2654_v7  ;;  %v2655_v38 = vadd.f32 %v3049_v27, %v2535_v37 }
 0x1dd   :  { %v2279_v41 = vpop.f32.mrb[36].mxu0 }
 0x1de   :  { %2719 = vst [vmem:[%s4867_s4 + $0x88] sm:$0xff] %v2655_v38  ;;  %v3105_v29 = vadd.f32 %v2279_v41, %v4394_v40  ;;  %v2281_v36 = vpop.f32.mrb[37].mxu0 }
 0x1df   :  { %v2282_v42 = vpop.f32.mrb[38].mxu0 }
 0x1e0   :  { %v2536_v46 = vmul.f32 %v3105_v29, %v3041_v26  ;;  %v3106_v33 = vadd.f32 %v2282_v42, %v4399_v43  ;;  %v2284_v48 = vpop.f32.mrb[39].mxu0 }
 0x1e2   :  { %v2656_v60 = vadd.f32 %v3049_v27, %v2536_v46  ;;  %v2537_v39 = vmul.f32 %v3106_v33, %v3041_v26 }
 0x1e4   :  { %2720 = vst [vmem:[%s4867_s4 + $0x90] sm:$0xff] %v2656_v60  ;;  %v2657_v51 = vadd.f32 %v3049_v27, %v2537_v39 }
 0x1e5   :  { %v2287_v53 = vpop.f32.mrb[40].mxu0 }
 0x1e6   :  { %2721 = vst [vmem:[%s4867_s4 + $0x98] sm:$0xff] %v2657_v51  ;;  %v3107_v40 = vadd.f32 %v2287_v53, %v4411_v50  ;;  %v2289_v56 = vpop.f32.mrb[41].mxu0 }
 0x1e7   :  { %v2290_v63 = vpop.f32.mrb[42].mxu0  ;;  %v3043_v56 = vld [vmem:[%s4865_s2 + $0x4] ss:$0 sm:$0xff] }
 0x1e8   :  { %v2538_v57 = vmul.f32 %v3107_v40, %v3041_v26  ;;  %v3108_v43 = vadd.f32 %v2290_v63, %v4416_v54  ;;  %v2292_v58 = vpop.f32.mrb[43].mxu0 }
 0x1ea   :  { %v2658_v62 = vadd.f32 %v3049_v27, %v2538_v57  ;;  %v2539_v1 = vmul.f32 %v3108_v43, %v3041_v26  ;;  %v3051_v43 = vld [vmem:[%s4866_s3 + $0x4] ss:$0 sm:$0xff] }
 0x1ec   :  { %2722 = vst [vmem:[%s4867_s4 + $0xa0] sm:$0xff] %v2658_v62  ;;  %v2659_v3 = vadd.f32 %v3049_v27, %v2539_v1 }
 0x1ed   :  { %v2295_v4 = vpop.f32.mrb[44].mxu0 }
 0x1ee   :  { %2723 = vst [vmem:[%s4867_s4 + $0xa8] sm:$0xff] %v2659_v3  ;;  %v3109_v50 = vadd.f32 %v2295_v4, %v4428_v61  ;;  %v2297_v5 = vpop.f32.mrb[45].mxu0 }
 0x1ef   :  { %v2298_v44 = vpop.f32.mrb[46].mxu0 }
 0x1f0   :  { %v2540_v6 = vmul.f32 %v3109_v50, %v3041_v26  ;;  %v3110_v54 = vadd.f32 %v2298_v44, %v4433_v2  ;;  %v2300_v10 = vpop.f32.mrb[47].mxu0 }
 0x1f2   :  { %v2660_v8 = vadd.f32 %v3049_v27, %v2540_v6  ;;  %v2541_v11 = vmul.f32 %v3110_v54, %v3041_v26 }
 0x1f4   :  { %2724 = vst [vmem:[%s4867_s4 + $0xb0] sm:$0xff] %v2660_v8  ;;  %v2661_v47 = vadd.f32 %v3049_v27, %v2541_v11 }
 0x1f5   :  { %v2303_v28 = vpop.f32.mrb[48].mxu0 }
 0x1f6   :  { %2725 = vst [vmem:[%s4867_s4 + $0xb8] sm:$0xff] %v2661_v47  ;;  %v3111_v61 = vadd.f32 %v2303_v28, %v4445_v9  ;;  %v2305_v2 = vpop.f32.mrb[49].mxu0 }
 0x1f7   :  { %v2306_v13 = vpop.f32.mrb[50].mxu0 }
 0x1f8   :  { %v2542_v17 = vmul.f32 %v3111_v61, %v3042_v14  ;;  %v3112_v18 = vadd.f32 %v2306_v13, %v4450_v12  ;;  %v2308_v20 = vpop.f32.mrb[51].mxu0 }
 0x1fa   :  { %v2662_v16 = vadd.f32 %v3050_v15, %v2542_v17  ;;  %v2543_v22 = vmul.f32 %v3112_v18, %v3042_v14 }
 0x1fc   :  { %2726 = vst [vmem:[%s4867_s4 + $0xc0] sm:$0xff] %v2662_v16  ;;  %v2663_v31 = vadd.f32 %v3050_v15, %v2543_v22 }
 0x1fd   :  { %v2311_v24 = vpop.f32.mrb[52].mxu0 }
 0x1fe   :  { %2727 = vst [vmem:[%s4867_s4 + $0xc8] sm:$0xff] %v2663_v31  ;;  %v3113_v9 = vadd.f32 %v2311_v24, %v4462_v19  ;;  %v2313_v52 = vpop.f32.mrb[53].mxu0 }
 0x1ff   :  { %v2314_v25 = vpop.f32.mrb[54].mxu0 }
 0x200   :  { %v2544_v26 = vmul.f32 %v3113_v9, %v3042_v14  ;;  %v3114_v12 = vadd.f32 %v2314_v25, %v4467_v23  ;;  %v2316_v21 = vpop.f32.mrb[55].mxu0 }
 0x202   :  { %v2664_v0 = vadd.f32 %v3050_v15, %v2544_v26  ;;  %v2545_v27 = vmul.f32 %v3114_v12, %v3042_v14 }
 0x204   :  { %2728 = vst [vmem:[%s4867_s4 + $0xd0] sm:$0xff] %v2664_v0  ;;  %v2665_v55 = vadd.f32 %v3050_v15, %v2545_v27 }
 0x205   :  { %v2319_v32 = vpop.f32.mrb[56].mxu0 }
 0x206   :  { %2729 = vst [vmem:[%s4867_s4 + $0xd8] sm:$0xff] %v2665_v55  ;;  %v3115_v19 = vadd.f32 %v2319_v32, %v4479_v30  ;;  %v2321_v59 = vpop.f32.mrb[57].mxu0 }
 0x207   :  { %v2322_v34 = vpop.f32.mrb[58].mxu0 }
 0x208   :  { %v2546_v7 = vmul.f32 %v3115_v19, %v3042_v14  ;;  %v3116_v23 = vadd.f32 %v2322_v34, %v4484_v35  ;;  %v2324_v37 = vpop.f32.mrb[59].mxu0 }
 0x20a   :  { %v2666_v38 = vadd.f32 %v3050_v15, %v2546_v7  ;;  %v2547_v41 = vmul.f32 %v3116_v23, %v3042_v14 }
 0x20c   :  { %2730 = vst [vmem:[%s4867_s4 + $0xe0] sm:$0xff] %v2666_v38  ;;  %v2667_v29 = vadd.f32 %v3050_v15, %v2547_v41 }
 0x20d   :  { %v2327_v36 = vpop.f32.mrb[60].mxu0 }
 0x20e   :  { %2731 = vst [vmem:[%s4867_s4 + $0xe8] sm:$0xff] %v2667_v29  ;;  %v3117_v30 = vadd.f32 %v2327_v36, %v4496_v45  ;;  %v2329_v42 = vpop.f32.mrb[61].mxu0 }
 0x20f   :  { %v2330_v46 = vpop.f32.mrb[62].mxu0 }
 0x210   :  { %v2548_v33 = vmul.f32 %v3117_v30, %v3042_v14  ;;  %v3118_v35 = vadd.f32 %v2330_v46, %v4501_v49  ;;  %v2332_v48 = vpop.f32.mrb[63].mxu0 }
 0x211   :  { %v3044_v48 = vld [vmem:[%s4865_s2 + $0x5] ss:$0 sm:$0xff] }
 0x212   :  { %v2668_v60 = vadd.f32 %v3050_v15, %v2548_v33  ;;  %v2549_v39 = vmul.f32 %v3118_v35, %v3042_v14 }
 0x214   :  { %2732 = vst [vmem:[%s4867_s4 + $0xf0] sm:$0xff] %v2668_v60  ;;  %v2669_v51 = vadd.f32 %v3050_v15, %v2549_v39  ;;  %v2046_v53 = vpop.f32.mrb[64].mxu1 }
 0x215   :  { %v2335_v40 = vpop.f32.mrb[64].mxu0  ;;  %v2048_v45 = vpop.f32.mrb[65].mxu1 }
 0x216   :  { %2733 = vst [vmem:[%s4867_s4 + $0xf8] sm:$0xff] %v2669_v51  ;;  %v3119_v49 = vadd.f32 %v2335_v40, %v2046_v53  ;;  %v2337_v63 = vpop.f32.mrb[65].mxu0  ;;  %v2049_v57 = vpop.f32.mrb[66].mxu1  ;;  %v3052_v40 = vld [vmem:[%s4866_s3 + $0x5] ss:$0 sm:$0xff] }
 0x217   :  { %v2338_v58 = vpop.f32.mrb[66].mxu0  ;;  %v2051_v62 = vpop.f32.mrb[67].mxu1 }
 0x218   :  { %v2550_v1 = vmul.f32 %v3119_v49, %v3043_v56  ;;  %v3120_v3 = vadd.f32 %v2338_v58, %v2049_v57  ;;  %v2340_v4 = vpop.f32.mrb[67].mxu0 }
 0x21a   :  { %v2670_v50 = vadd.f32 %v3051_v43, %v2550_v1  ;;  %v2551_v5 = vmul.f32 %v3120_v3, %v3043_v56 }
 0x21c   :  { %2734 = vst [vmem:[%s4867_s4 + $0x100] sm:$0xff] %v2670_v50  ;;  %v2671_v44 = vadd.f32 %v3051_v43, %v2551_v5  ;;  %v2054_v6 = vpop.f32.mrb[68].mxu1 }
 0x21d   :  { %v2343_v54 = vpop.f32.mrb[68].mxu0  ;;  %v2056_v10 = vpop.f32.mrb[69].mxu1 }
 0x21e   :  { %2735 = vst [vmem:[%s4867_s4 + $0x108] sm:$0xff] %v2671_v44  ;;  %v3121_v8 = vadd.f32 %v2343_v54, %v2054_v6  ;;  %v2345_v11 = vpop.f32.mrb[69].mxu0  ;;  %v2057_v47 = vpop.f32.mrb[70].mxu1 }
 0x21f   :  { %v2346_v28 = vpop.f32.mrb[70].mxu0  ;;  %v2059_v14 = vpop.f32.mrb[71].mxu1 }
 0x220   :  { %v2552_v61 = vmul.f32 %v3121_v8, %v3043_v56  ;;  %v3122_v2 = vadd.f32 %v2346_v28, %v2057_v47  ;;  %v2348_v15 = vpop.f32.mrb[71].mxu0 }
 0x222   :  { %v2672_v13 = vadd.f32 %v3051_v43, %v2552_v61  ;;  %v2553_v17 = vmul.f32 %v3122_v2, %v3043_v56 }
 0x224   :  { %2736 = vst [vmem:[%s4867_s4 + $0x110] sm:$0xff] %v2672_v13  ;;  %v2673_v18 = vadd.f32 %v3051_v43, %v2553_v17  ;;  %v2062_v20 = vpop.f32.mrb[72].mxu1 }
 0x225   :  { %v2351_v16 = vpop.f32.mrb[72].mxu0  ;;  %v2064_v22 = vpop.f32.mrb[73].mxu1 }
 0x226   :  { %2737 = vst [vmem:[%s4867_s4 + $0x118] sm:$0xff] %v2673_v18  ;;  %v3123_v31 = vadd.f32 %v2351_v16, %v2062_v20  ;;  %v2353_v24 = vpop.f32.mrb[73].mxu0  ;;  %v2065_v9 = vpop.f32.mrb[74].mxu1 }
 0x227   :  { %v2354_v52 = vpop.f32.mrb[74].mxu0  ;;  %v2067_v25 = vpop.f32.mrb[75].mxu1 }
 0x228   :  { %v2554_v26 = vmul.f32 %v3123_v31, %v3043_v56  ;;  %v3124_v12 = vadd.f32 %v2354_v52, %v2065_v9  ;;  %v2356_v21 = vpop.f32.mrb[75].mxu0 }
 0x22a   :  { %v2674_v0 = vadd.f32 %v3051_v43, %v2554_v26  ;;  %v2555_v27 = vmul.f32 %v3124_v12, %v3043_v56 }
 0x22c   :  { %2738 = vst [vmem:[%s4867_s4 + $0x120] sm:$0xff] %v2674_v0  ;;  %v2675_v55 = vadd.f32 %v3051_v43, %v2555_v27  ;;  %v2070_v32 = vpop.f32.mrb[76].mxu1 }
 0x22d   :  { %v2359_v19 = vpop.f32.mrb[76].mxu0  ;;  %v2072_v59 = vpop.f32.mrb[77].mxu1 }
 0x22e   :  { %2739 = vst [vmem:[%s4867_s4 + $0x128] sm:$0xff] %v2675_v55  ;;  %v3125_v34 = vadd.f32 %v2359_v19, %v2070_v32  ;;  %v2361_v7 = vpop.f32.mrb[77].mxu0  ;;  %v2073_v23 = vpop.f32.mrb[78].mxu1 }
 0x22f   :  { %v2362_v37 = vpop.f32.mrb[78].mxu0  ;;  %v2075_v38 = vpop.f32.mrb[79].mxu1 }
 0x230   :  { %v2556_v41 = vmul.f32 %v3125_v34, %v3043_v56  ;;  %v3126_v29 = vadd.f32 %v2362_v37, %v2073_v23  ;;  %v2364_v36 = vpop.f32.mrb[79].mxu0 }
 0x231   :  { %v3045_v36 = vld [vmem:[%s4865_s2 + $0x6] ss:$0 sm:$0xff] }
 0x232   :  { %v2676_v30 = vadd.f32 %v3051_v43, %v2556_v41  ;;  %v2557_v42 = vmul.f32 %v3126_v29, %v3043_v56 }
 0x234   :  { %2740 = vst [vmem:[%s4867_s4 + $0x130] sm:$0xff] %v2676_v30  ;;  %v2677_v46 = vadd.f32 %v3051_v43, %v2557_v42  ;;  %v2078_v33 = vpop.f32.mrb[80].mxu1 }
 0x235   :  { %v2367_v35 = vpop.f32.mrb[80].mxu0  ;;  %v2080_v60 = vpop.f32.mrb[81].mxu1 }
 0x236   :  { %2741 = vst [vmem:[%s4867_s4 + $0x138] sm:$0xff] %v2677_v46  ;;  %v3127_v39 = vadd.f32 %v2367_v35, %v2078_v33  ;;  %v2369_v51 = vpop.f32.mrb[81].mxu0  ;;  %v2081_v53 = vpop.f32.mrb[82].mxu1  ;;  %v3053_v35 = vld [vmem:[%s4866_s3 + $0x6] ss:$0 sm:$0xff] }
 0x237   :  { %v2370_v56 = vpop.f32.mrb[82].mxu0  ;;  %v2083_v45 = vpop.f32.mrb[83].mxu1 }
 0x238   :  { %v2558_v49 = vmul.f32 %v3127_v39, %v3044_v48  ;;  %v3128_v63 = vadd.f32 %v2370_v56, %v2081_v53  ;;  %v2372_v57 = vpop.f32.mrb[83].mxu0 }
 0x23a   :  { %v2678_v43 = vadd.f32 %v3052_v40, %v2558_v49  ;;  %v2559_v58 = vmul.f32 %v3128_v63, %v3044_v48 }
 0x23c   :  { %2742 = vst [vmem:[%s4867_s4 + $0x140] sm:$0xff] %v2678_v43  ;;  %v2679_v62 = vadd.f32 %v3052_v40, %v2559_v58  ;;  %v2086_v1 = vpop.f32.mrb[84].mxu1 }
 0x23d   :  { %v2375_v3 = vpop.f32.mrb[84].mxu0  ;;  %v2088_v4 = vpop.f32.mrb[85].mxu1 }
 0x23e   :  { %2743 = vst [vmem:[%s4867_s4 + $0x148] sm:$0xff] %v2679_v62  ;;  %v3129_v50 = vadd.f32 %v2375_v3, %v2086_v1  ;;  %v2377_v5 = vpop.f32.mrb[85].mxu0  ;;  %v2089_v44 = vpop.f32.mrb[86].mxu1 }
 0x23f   :  { %v2378_v6 = vpop.f32.mrb[86].mxu0  ;;  %v2091_v54 = vpop.f32.mrb[87].mxu1 }
 0x240   :  { %v2560_v10 = vmul.f32 %v3129_v50, %v3044_v48  ;;  %v3130_v8 = vadd.f32 %v2378_v6, %v2089_v44  ;;  %v2380_v11 = vpop.f32.mrb[87].mxu0 }
 0x242   :  { %v2680_v47 = vadd.f32 %v3052_v40, %v2560_v10  ;;  %v2561_v28 = vmul.f32 %v3130_v8, %v3044_v48 }
 0x244   :  { %2744 = vst [vmem:[%s4867_s4 + $0x150] sm:$0xff] %v2680_v47  ;;  %v2681_v14 = vadd.f32 %v3052_v40, %v2561_v28  ;;  %v2094_v61 = vpop.f32.mrb[88].mxu1 }
 0x245   :  { %v2383_v2 = vpop.f32.mrb[88].mxu0  ;;  %v2096_v15 = vpop.f32.mrb[89].mxu1 }
 0x246   :  { %2745 = vst [vmem:[%s4867_s4 + $0x158] sm:$0xff] %v2681_v14  ;;  %v3131_v13 = vadd.f32 %v2383_v2, %v2094_v61  ;;  %v2385_v17 = vpop.f32.mrb[89].mxu0  ;;  %v2097_v18 = vpop.f32.mrb[90].mxu1 }
 0x247   :  { %v2386_v20 = vpop.f32.mrb[90].mxu0  ;;  %v2099_v16 = vpop.f32.mrb[91].mxu1 }
 0x248   :  { %v2562_v22 = vmul.f32 %v3131_v13, %v3044_v48  ;;  %v3132_v31 = vadd.f32 %v2386_v20, %v2097_v18  ;;  %v2388_v24 = vpop.f32.mrb[91].mxu0 }
 0x24a   :  { %v2682_v9 = vadd.f32 %v3052_v40, %v2562_v22  ;;  %v2563_v52 = vmul.f32 %v3132_v31, %v3044_v48 }
 0x24c   :  { %2746 = vst [vmem:[%s4867_s4 + $0x160] sm:$0xff] %v2682_v9  ;;  %v2683_v25 = vadd.f32 %v3052_v40, %v2563_v52  ;;  %v2102_v26 = vpop.f32.mrb[92].mxu1 }
 0x24d   :  { %v2391_v12 = vpop.f32.mrb[92].mxu0  ;;  %v2104_v21 = vpop.f32.mrb[93].mxu1 }
 0x24e   :  { %2747 = vst [vmem:[%s4867_s4 + $0x168] sm:$0xff] %v2683_v25  ;;  %v3133_v0 = vadd.f32 %v2391_v12, %v2102_v26  ;;  %v2393_v27 = vpop.f32.mrb[93].mxu0  ;;  %v2105_v55 = vpop.f32.mrb[94].mxu1 }
 0x24f   :  { %v2394_v32 = vpop.f32.mrb[94].mxu0  ;;  %v2107_v19 = vpop.f32.mrb[95].mxu1 }
 0x250   :  { %v2564_v59 = vmul.f32 %v3133_v0, %v3044_v48  ;;  %v3134_v34 = vadd.f32 %v2394_v32, %v2105_v55  ;;  %v2396_v7 = vpop.f32.mrb[95].mxu0 }
 0x251   :  { %v3046_v7 = vld [vmem:[%s4865_s2 + $0x7] ss:$0 sm:$0xff] }
 0x252   :  { %v2684_v23 = vadd.f32 %v3052_v40, %v2564_v59  ;;  %v2565_v37 = vmul.f32 %v3134_v34, %v3044_v48 }
 0x254   :  { %2748 = vst [vmem:[%s4867_s4 + $0x170] sm:$0xff] %v2684_v23  ;;  %v2685_v38 = vadd.f32 %v3052_v40, %v2565_v37  ;;  %v2110_v41 = vpop.f32.mrb[96].mxu1 }
 0x255   :  { %v2399_v29 = vpop.f32.mrb[96].mxu0  ;;  %v2112_v30 = vpop.f32.mrb[97].mxu1 }
 0x256   :  { %2749 = vst [vmem:[%s4867_s4 + $0x178] sm:$0xff] %v2685_v38  ;;  %v3135_v42 = vadd.f32 %v2399_v29, %v2110_v41  ;;  %v2401_v46 = vpop.f32.mrb[97].mxu0  ;;  %v2113_v33 = vpop.f32.mrb[98].mxu1  ;;  %v3054_v29 = vld [vmem:[%s4866_s3 + $0x7] ss:$0 sm:$0xff] }
 0x257   :  { %v2402_v48 = vpop.f32.mrb[98].mxu0  ;;  %v2115_v60 = vpop.f32.mrb[99].mxu1 }
 0x258   :  { %v2566_v39 = vmul.f32 %v3135_v42, %v3045_v36  ;;  %v3136_v51 = vadd.f32 %v2402_v48, %v2113_v33  ;;  %v2404_v53 = vpop.f32.mrb[99].mxu0 }
 0x25a   :  { %v2686_v40 = vadd.f32 %v3053_v35, %v2566_v39  ;;  %v2567_v56 = vmul.f32 %v3136_v51, %v3045_v36 }
 0x25c   :  { %2750 = vst [vmem:[%s4867_s4 + $0x180] sm:$0xff] %v2686_v40  ;;  %v2687_v45 = vadd.f32 %v3053_v35, %v2567_v56  ;;  %v2118_v49 = vpop.f32.mrb[100].mxu1 }
 0x25d   :  { %v2407_v63 = vpop.f32.mrb[100].mxu0  ;;  %v2120_v57 = vpop.f32.mrb[101].mxu1 }
 0x25e   :  { %2751 = vst [vmem:[%s4867_s4 + $0x188] sm:$0xff] %v2687_v45  ;;  %v3137_v43 = vadd.f32 %v2407_v63, %v2118_v49  ;;  %v2409_v58 = vpop.f32.mrb[101].mxu0  ;;  %v2121_v62 = vpop.f32.mrb[102].mxu1 }
 0x25f   :  { %v2410_v1 = vpop.f32.mrb[102].mxu0  ;;  %v2123_v3 = vpop.f32.mrb[103].mxu1 }
 0x260   :  { %v2568_v4 = vmul.f32 %v3137_v43, %v3045_v36  ;;  %v3138_v50 = vadd.f32 %v2410_v1, %v2121_v62  ;;  %v2412_v5 = vpop.f32.mrb[103].mxu0 }
 0x262   :  { %v2688_v44 = vadd.f32 %v3053_v35, %v2568_v4  ;;  %v2569_v6 = vmul.f32 %v3138_v50, %v3045_v36 }
 0x264   :  { %2752 = vst [vmem:[%s4867_s4 + $0x190] sm:$0xff] %v2688_v44  ;;  %v2689_v54 = vadd.f32 %v3053_v35, %v2569_v6  ;;  %v2126_v10 = vpop.f32.mrb[104].mxu1 }
 0x265   :  { %v2415_v8 = vpop.f32.mrb[104].mxu0  ;;  %v2128_v11 = vpop.f32.mrb[105].mxu1 }
 0x266   :  { %2753 = vst [vmem:[%s4867_s4 + $0x198] sm:$0xff] %v2689_v54  ;;  %v3139_v47 = vadd.f32 %v2415_v8, %v2126_v10  ;;  %v2417_v28 = vpop.f32.mrb[105].mxu0  ;;  %v2129_v14 = vpop.f32.mrb[106].mxu1 }
 0x267   :  { %v2418_v61 = vpop.f32.mrb[106].mxu0  ;;  %v2131_v2 = vpop.f32.mrb[107].mxu1 }
 0x268   :  { %v2570_v15 = vmul.f32 %v3139_v47, %v3045_v36  ;;  %v3140_v13 = vadd.f32 %v2418_v61, %v2129_v14  ;;  %v2420_v17 = vpop.f32.mrb[107].mxu0 }
 0x26a   :  { %v2690_v18 = vadd.f32 %v3053_v35, %v2570_v15  ;;  %v2571_v20 = vmul.f32 %v3140_v13, %v3045_v36 }
 0x26c   :  { %2754 = vst [vmem:[%s4867_s4 + $0x1a0] sm:$0xff] %v2690_v18  ;;  %v2691_v16 = vadd.f32 %v3053_v35, %v2571_v20  ;;  %v2134_v22 = vpop.f32.mrb[108].mxu1 }
 0x26d   :  { %v2423_v31 = vpop.f32.mrb[108].mxu0  ;;  %v2136_v24 = vpop.f32.mrb[109].mxu1 }
 0x26e   :  { %2755 = vst [vmem:[%s4867_s4 + $0x1a8] sm:$0xff] %v2691_v16  ;;  %v3141_v9 = vadd.f32 %v2423_v31, %v2134_v22  ;;  %v2425_v52 = vpop.f32.mrb[109].mxu0  ;;  %v2137_v25 = vpop.f32.mrb[110].mxu1 }
 0x26f   :  { %v2426_v26 = vpop.f32.mrb[110].mxu0  ;;  %v2139_v12 = vpop.f32.mrb[111].mxu1 }
 0x270   :  { %v2572_v21 = vmul.f32 %v3141_v9, %v3045_v36  ;;  %v3142_v0 = vadd.f32 %v2426_v26, %v2137_v25  ;;  %v2428_v27 = vpop.f32.mrb[111].mxu0 }
 0x272   :  { %v2692_v55 = vadd.f32 %v3053_v35, %v2572_v21  ;;  %v2573_v32 = vmul.f32 %v3142_v0, %v3045_v36 }
 0x274   :  { %2756 = vst [vmem:[%s4867_s4 + $0x1b0] sm:$0xff] %v2692_v55  ;;  %v2693_v19 = vadd.f32 %v3053_v35, %v2573_v32  ;;  %v2142_v59 = vpop.f32.mrb[112].mxu1 }
 0x275   :  { %v2431_v34 = vpop.f32.mrb[112].mxu0  ;;  %v2144_v23 = vpop.f32.mrb[113].mxu1 }
 0x276   :  { %2757 = vst [vmem:[%s4867_s4 + $0x1b8] sm:$0xff] %v2693_v19  ;;  %v3143_v37 = vadd.f32 %v2431_v34, %v2142_v59  ;;  %v2433_v38 = vpop.f32.mrb[113].mxu0  ;;  %v2145_v41 = vpop.f32.mrb[114].mxu1 }
 0x277   :  { %v2434_v36 = vpop.f32.mrb[114].mxu0  ;;  %v2147_v30 = vpop.f32.mrb[115].mxu1 }
 0x278   :  { %v2574_v42 = vmul.f32 %v3143_v37, %v3046_v7  ;;  %v3144_v46 = vadd.f32 %v2434_v36, %v2145_v41  ;;  %v2436_v33 = vpop.f32.mrb[115].mxu0 }
 0x27a   :  { %v2694_v35 = vadd.f32 %v3054_v29, %v2574_v42  ;;  %v2575_v48 = vmul.f32 %v3144_v46, %v3046_v7 }
 0x27c   :  { %2758 = vst [vmem:[%s4867_s4 + $0x1c0] sm:$0xff] %v2694_v35  ;;  %v2695_v60 = vadd.f32 %v3054_v29, %v2575_v48  ;;  %v2150_v39 = vpop.f32.mrb[116].mxu1 }
 0x27d   :  { %v2439_v51 = vpop.f32.mrb[116].mxu0  ;;  %v2152_v53 = vpop.f32.mrb[117].mxu1 }
 0x27e   :  { %2759 = vst [vmem:[%s4867_s4 + $0x1c8] sm:$0xff] %v2695_v60  ;;  %v3145_v40 = vadd.f32 %v2439_v51, %v2150_v39  ;;  %v2441_v56 = vpop.f32.mrb[117].mxu0  ;;  %v2153_v45 = vpop.f32.mrb[118].mxu1 }
 0x27f   :  { %v2442_v49 = vpop.f32.mrb[118].mxu0  ;;  %v2155_v63 = vpop.f32.mrb[119].mxu1 }
 0x280   :  { %v2576_v57 = vmul.f32 %v3145_v40, %v3046_v7  ;;  %v3146_v43 = vadd.f32 %v2442_v49, %v2153_v45  ;;  %v2444_v58 = vpop.f32.mrb[119].mxu0 }
 0x282   :  { %v2696_v62 = vadd.f32 %v3054_v29, %v2576_v57  ;;  %v2577_v1 = vmul.f32 %v3146_v43, %v3046_v7 }
 0x284   :  { %2760 = vst [vmem:[%s4867_s4 + $0x1d0] sm:$0xff] %v2696_v62  ;;  %v2697_v3 = vadd.f32 %v3054_v29, %v2577_v1  ;;  %v2158_v4 = vpop.f32.mrb[120].mxu1 }
 0x285   :  { %v2447_v50 = vpop.f32.mrb[120].mxu0  ;;  %v2160_v5 = vpop.f32.mrb[121].mxu1 }
 0x286   :  { %2761 = vst [vmem:[%s4867_s4 + $0x1d8] sm:$0xff] %v2697_v3  ;;  %v3147_v44 = vadd.f32 %v2447_v50, %v2158_v4  ;;  %v2449_v6 = vpop.f32.mrb[121].mxu0  ;;  %v2161_v54 = vpop.f32.mrb[122].mxu1 }
 0x287   :  { %v2450_v10 = vpop.f32.mrb[122].mxu0  ;;  %v2163_v8 = vpop.f32.mrb[123].mxu1 }
 0x288   :  { %v2578_v11 = vmul.f32 %v3147_v44, %v3046_v7  ;;  %v3148_v47 = vadd.f32 %v2450_v10, %v2161_v54  ;;  %v2452_v28 = vpop.f32.mrb[123].mxu0 }
 0x28a   :  { %v2698_v14 = vadd.f32 %v3054_v29, %v2578_v11  ;;  %v2579_v61 = vmul.f32 %v3148_v47, %v3046_v7 }
 0x28c   :  { %2762 = vst [vmem:[%s4867_s4 + $0x1e0] sm:$0xff] %v2698_v14  ;;  %v2699_v2 = vadd.f32 %v3054_v29, %v2579_v61  ;;  %v2166_v15 = vpop.f32.mrb[124].mxu1 }
 0x28d   :  { %v2455_v13 = vpop.f32.mrb[124].mxu0  ;;  %v2168_v17 = vpop.f32.mrb[125].mxu1 }
 0x28e   :  { %2763 = vst [vmem:[%s4867_s4 + $0x1e8] sm:$0xff] %v2699_v2  ;;  %v3149_v18 = vadd.f32 %v2455_v13, %v2166_v15  ;;  %v2457_v20 = vpop.f32.mrb[125].mxu0  ;;  %v2169_v16 = vpop.f32.mrb[126].mxu1 }
 0x28f   :  { %v2458_v22 = vpop.f32.mrb[126].mxu0  ;;  %v2171_v31 = vpop.f32.mrb[127].mxu1 }
 0x290   :  { %v2580_v24 = vmul.f32 %v3149_v18, %v3046_v7  ;;  %v3150_v9 = vadd.f32 %v2458_v22, %v2169_v16  ;;  %v2460_v52 = vpop.f32.mrb[127].mxu0 }
 0x292   :  { %v2700_v25 = vadd.f32 %v3054_v29, %v2580_v24  ;;  %v2581_v26 = vmul.f32 %v3150_v9, %v3046_v7 }
 0x294   :  { %2764 = vst [vmem:[%s4867_s4 + $0x1f0] sm:$0xff] %v2700_v25  ;;  %v2701_v12 = vadd.f32 %v3054_v29, %v2581_v26 }
 0x296   :  { %2765 = vst [vmem:[%s4867_s4 + $0x1f8] sm:$0xff] %v2701_v12 }

</bundles_post_ra>
